<compile_context>
chip_gen: v7x
topology: tpu7x:2x2x1
jax: 0.10.0
libtpu: 0.0.40
codegen_flags: <defaults>
</compile_context>

<pallas_src>
import math
import numpy as np
import jax
import jax.numpy as jnp
from jax import lax
from jax.experimental import pallas as pl
from jax.experimental.pallas import tpu as pltpu

# ---- model hyperparameters -------------------------------------------------
D_MODEL = 32     # input_size
HIDDEN = 32      # hidden_size
N_LAYERS = 2     # nlayers
OUT_SIZE = 4     # output_size
D_FF = 512       # dim_feedforward (fixed constant in the PyTorch module)
SEQ = 8
BATCH = 2
LN_EPS = 1e-5
HEAD_PAD = 128   # lane-dense padding of the folded head output


# ---- fused Pallas kernel ----------------------------------------------------
def _fused_kernel(x_ref, w_attn_ref, b_attn_ref, wff1_ref, bff1_ref,
                  wff2t_ref, small_ref, w_head_ref, b_head_ref, o_ref):
    BS = BATCH * SEQ
    x = x_ref[...]                                   # (B*S, D) f32, row r = s*B + b

    # Additive block-diagonal mask: token i attends only within its own batch element.
    row_b = lax.broadcasted_iota(jnp.int32, (BS, BS), 0) % BATCH
    col_b = lax.broadcasted_iota(jnp.int32, (BS, BS), 1) % BATCH
    mask_add = jnp.where(row_b == col_b, 0.0, -1e30).astype(jnp.float32)

    # Selection matrix: output row s <- slab row s*B + (B-1) (last batch element).
    sel_r = lax.broadcasted_iota(jnp.int32, (SEQ, BS), 0)
    sel_c = lax.broadcasted_iota(jnp.int32, (SEQ, BS), 1)
    sel = (sel_c == sel_r * BATCH + (BATCH - 1)).astype(jnp.float32)

    scale = 1.0 / math.sqrt(D_MODEL)

    for li in range(N_LAYERS):                       # unrolled (N_LAYERS=2)
        w_attn = w_attn_ref[li]                      # (D, 128) = [wq | wk | wv | wo]
        b_attn = b_attn_ref[li]                      # (1, 128) = [bq | bk | bv | bo]
        small = small_ref[li]                        # (5, D)   = [g1, b1, g2, b2, bff2]

        # --- single-head self attention (one lane-dense (32,128) projection slab) ---
        # Full 128-lane matmul; cols 96:128 (x@wo) are simply ignored.
        proj = jnp.dot(x, w_attn, preferred_element_type=jnp.float32) + b_attn
        q = proj[:, 0:D_MODEL]
        k = proj[:, D_MODEL:2 * D_MODEL]
        v = proj[:, 2 * D_MODEL:3 * D_MODEL]

        # q @ k^T without an explicit transpose (contract dim 1 of both operands).
        scores = lax.dot_general(q, k, (((1,), (1,)), ((), ())),
                                 preferred_element_type=jnp.float32) * scale + mask_add
        m = jnp.max(scores, axis=-1, keepdims=True)
        e = jnp.exp(scores - m)
        denom = jnp.sum(e, axis=-1, keepdims=True)
        p = e * pl.reciprocal(denom, approx=True)
        attn = jnp.dot(p, v, preferred_element_type=jnp.float32)
        attn = (jnp.dot(attn, w_attn[:, 3 * D_MODEL:4 * D_MODEL],
                        preferred_element_type=jnp.float32)
                + b_attn[:, 3 * D_MODEL:4 * D_MODEL])

        # residual + LayerNorm1 (post-norm; parallel moments; dropout == identity)
        h = x + attn
        mu = jnp.mean(h, axis=-1, keepdims=True)
        msq = jnp.mean(h * h, axis=-1, keepdims=True)
        var = msq - mu * mu
        h = (h - mu) * lax.rsqrt(var + LN_EPS) * small[0:1, :] + small[1:2, :]

        # --- feed-forward (ReLU); wff2 stored transposed (D, D_FF), lane-dense ---
        ff = jnp.dot(h, wff1_ref[li], preferred_element_type=jnp.float32) + bff1_ref[li]
        ff = jnp.maximum(ff, 0.0)
        ff = lax.dot_general(ff, wff2t_ref[li], (((1,), (1,)), ((), ())),
                             preferred_element_type=jnp.float32) + small[4:5, :]

        # residual + LayerNorm2 (parallel moments)
        h2 = h + ff
        mu2 = jnp.mean(h2, axis=-1, keepdims=True)
        msq2 = jnp.mean(h2 * h2, axis=-1, keepdims=True)
        var2 = msq2 - mu2 * mu2
        x = (h2 - mu2) * lax.rsqrt(var2 + LN_EPS) * small[2:3, :] + small[3:4, :]

    # --- head: select last-batch rows via tiny matmul, one folded matmul, full-tile store
    last = jnp.dot(sel, x, preferred_element_type=jnp.float32)          # (S, D)
    out = jnp.dot(last, w_head_ref[...], preferred_element_type=jnp.float32) + b_head_ref[...]
    o_ref[...] = out.astype(o_ref.dtype)


# ---- packing: stack per-layer weights, fold the head ------------------------
def pack_params(layer_params, head_params):
    w_attn = jnp.stack([jnp.concatenate([lp["wq"], lp["wk"], lp["wv"], lp["wo"]], axis=1)
                        for lp in layer_params])                  # (L, D, 128)
    b_attn = jnp.stack([jnp.concatenate([lp["bq"], lp["bk"], lp["bv"], lp["bo"]], axis=1)
                        for lp in layer_params])                  # (L, 1, 128)
    wff1 = jnp.stack([lp["wff1"] for lp in layer_params])         # (L, D, D_FF)
    bff1 = jnp.stack([lp["bff1"] for lp in layer_params])         # (L, 1, D_FF)
    wff2t = jnp.stack([lp["wff2"].T for lp in layer_params])      # (L, D, D_FF) lane-dense
    small = jnp.stack([jnp.concatenate([lp["ln1_g"], lp["ln1_b"], lp["ln2_g"],
                                        lp["ln2_b"], lp["bff2"]], axis=0)
                       for lp in layer_params])                   # (L, 5, D)

    # Fold ffn/linear1/linear2/linear3 (no activations between) into one affine map.
    w = head_params["wffn"] @ head_params["wl1"] @ head_params["wl2"] @ head_params["wl3"]
    b = ((head_params["bffn"] @ head_params["wl1"] + head_params["bl1"])
         @ head_params["wl2"] + head_params["bl2"]) @ head_params["wl3"] + head_params["bl3"]
    w_head = jnp.zeros((D_MODEL, HEAD_PAD), jnp.float32).at[:, :OUT_SIZE].set(w)
    b_head = jnp.zeros((1, HEAD_PAD), jnp.float32).at[:, :OUT_SIZE].set(b)

    return dict(w_attn=w_attn, b_attn=b_attn, wff1=wff1, bff1=bff1, wff2t=wff2t,
                small=small, w_head=w_head, b_head=b_head)


# ---- forward (one pallas_call, no grid, whole-array VMEM blocks) ------------
@jax.jit
def transformer_base_forward(x_sbd, packed):
    # x_sbd: (S, B, D).  Row-major contiguous reshape (bitcast, no copy) to the
    # interleaved (B*S, D) slab: row r = s*B + b.
    S, B, D = x_sbd.shape
    x = x_sbd.reshape(S * B, D)

    args = [x, packed["w_attn"], packed["b_attn"], packed["wff1"], packed["bff1"],
            packed["wff2t"], packed["small"], packed["w_head"], packed["b_head"]]

    vmem = pltpu.MemorySpace.VMEM
    out_pad = pl.pallas_call(
        _fused_kernel,
        out_shape=jax.ShapeDtypeStruct((SEQ, HEAD_PAD), jnp.float32),
        in_specs=[pl.BlockSpec(memory_space=vmem) for _ in args],
        out_specs=pl.BlockSpec(memory_space=vmem),
    )(*args)
    # Return the lane-dense padded block; the consumer takes [:, :OUT_SIZE].
    return out_pad


# ---- deterministic parameter init ------------------------------------------
def init_params(key):
    def w(key, shape, scale=0.05):
        return (scale * jax.random.normal(key, shape)).astype(jnp.float32)

    layer_params = []
    for li in range(N_LAYERS):
        k = jax.random.fold_in(key, li)
        ks = jax.random.split(k, 8)
        layer_params.append(dict(
            wq=w(ks[0], (D_MODEL, D_MODEL)), bq=w(ks[1], (1, D_MODEL)),
            wk=w(ks[2], (D_MODEL, D_MODEL)), bk=w(ks[3], (1, D_MODEL)),
            wv=w(ks[4], (D_MODEL, D_MODEL)), bv=w(ks[5], (1, D_MODEL)),
            wo=w(ks[6], (D_MODEL, D_MODEL)), bo=jnp.zeros((1, D_MODEL), jnp.float32),
            ln1_g=jnp.ones((1, D_MODEL), jnp.float32), ln1_b=jnp.zeros((1, D_MODEL), jnp.float32),
            wff1=w(ks[7], (D_MODEL, D_FF)), bff1=jnp.zeros((1, D_FF), jnp.float32),
            wff2=w(jax.random.fold_in(k, 100), (D_FF, D_MODEL)),
            bff2=jnp.zeros((1, D_MODEL), jnp.float32),
            ln2_g=jnp.ones((1, D_MODEL), jnp.float32), ln2_b=jnp.zeros((1, D_MODEL), jnp.float32),
        ))

    hk = jax.random.fold_in(key, 999)
    hks = jax.random.split(hk, 4)
    head_params = dict(
        wffn=w(hks[0], (D_MODEL, HIDDEN)), bffn=jnp.zeros((1, HIDDEN), jnp.float32),
        wl1=w(hks[1], (HIDDEN, HIDDEN // 2)), bl1=jnp.zeros((1, HIDDEN // 2), jnp.float32),
        wl2=w(hks[2], (HIDDEN // 2, HIDDEN // 4)), bl2=jnp.zeros((1, HIDDEN // 4), jnp.float32),
        wl3=w(hks[3], (HIDDEN // 4, OUT_SIZE)), bl3=jnp.zeros((1, OUT_SIZE), jnp.float32),
    )
    return layer_params, head_params


# ---- pure-JAX reference (PyTorch semantics, eval mode) ----------------------
def reference_forward(x_sbd, layer_params, head_params):
    h = x_sbd                                   # (S, B, D)
    for lp in layer_params:
        q = jnp.einsum("sbd,de->sbe", h, lp["wq"]) + lp["bq"]
        k = jnp.einsum("sbd,de->sbe", h, lp["wk"]) + lp["bk"]
        v = jnp.einsum("sbd,de->sbe", h, lp["wv"]) + lp["bv"]
        scores = jnp.einsum("sbd,tbd->bst", q, k) / math.sqrt(D_MODEL)
        p = jax.nn.softmax(scores, axis=-1)
        attn = jnp.einsum("bst,tbd->sbd", p, v)
        attn = jnp.einsum("sbd,de->sbe", attn, lp["wo"]) + lp["bo"]
        y = h + attn
        mu = jnp.mean(y, axis=-1, keepdims=True)
        var = jnp.mean((y - mu) ** 2, axis=-1, keepdims=True)
        y = (y - mu) * lax.rsqrt(var + LN_EPS) * lp["ln1_g"] + lp["ln1_b"]
        ff = jnp.maximum(jnp.einsum("sbd,df->sbf", y, lp["wff1"]) + lp["bff1"], 0.0)
        ff = jnp.einsum("sbf,fd->sbd", ff, lp["wff2"]) + lp["bff2"]
        y2 = y + ff
        mu2 = jnp.mean(y2, axis=-1, keepdims=True)
        var2 = jnp.mean((y2 - mu2) ** 2, axis=-1, keepdims=True)
        h = (y2 - mu2) * lax.rsqrt(var2 + LN_EPS) * lp["ln2_g"] + lp["ln2_b"]
    out = jnp.einsum("sbd,dh->sbh", h, head_params["wffn"]) + head_params["bffn"]
    out = out[:, -1, :]                         # (S, HIDDEN) -- last index of dim 1
    out = out @ head_params["wl1"] + head_params["bl1"]
    out = out @ head_params["wl2"] + head_params["bl2"]
    out = out @ head_params["wl3"] + head_params["bl3"]
    return out


# ---- main -------------------------------------------------------------------
if __name__ == "__main__":
    key = jax.random.PRNGKey(0)
    pkey, xkey = jax.random.split(key)
    layer_params, head_params = init_params(pkey)
    packed = pack_params(layer_params, head_params)

    # layout: (seq, batch, d_model)
    x = jax.random.normal(xkey, (SEQ, BATCH, D_MODEL), dtype=jnp.float32)

    out_pad = transformer_base_forward(x, packed)
    out_pad = jax.block_until_ready(out_pad)
    out = np.asarray(out_pad)[:, :OUT_SIZE]     # consumer-side slice of the padded tile
    assert out.shape == (SEQ, OUT_SIZE), out.shape

    ref = reference_forward(x, layer_params, head_params)
    np.testing.assert_allclose(out, np.asarray(ref), rtol=2e-3, atol=2e-3)

    print("KERNEL_OK")
</pallas_src>

<mosaic_0001>
module attributes {stable_mosaic.version = 11 : i64} {
  func.func @_fused_kernel(%arg0: memref<16x32xf32, #tpu.memory_space<vmem>>, %arg1: memref<2x32x128xf32, #tpu.memory_space<vmem>>, %arg2: memref<2x1x128xf32, #tpu.memory_space<vmem>>, %arg3: memref<2x32x512xf32, #tpu.memory_space<vmem>>, %arg4: memref<2x1x512xf32, #tpu.memory_space<vmem>>, %arg5: memref<2x32x512xf32, #tpu.memory_space<vmem>>, %arg6: memref<2x5x32xf32, #tpu.memory_space<vmem>>, %arg7: memref<32x128xf32, #tpu.memory_space<vmem>>, %arg8: memref<1x128xf32, #tpu.memory_space<vmem>>, %arg9: memref<8x128xf32, #tpu.memory_space<vmem>>) attributes {dimension_semantics = [], scalar_prefetch = 0 : i64, scratch_operands = 0 : i64, tpu.core_type = #tpu.core_type<tc>} {
    %c0 = arith.constant 0 : index
    %c0_0 = arith.constant 0 : index
    %0 = vector.load %arg0[%c0, %c0_0] : memref<16x32xf32, #tpu.memory_space<vmem>>, vector<16x32xf32>
    %1 = tpu.iota {dimensions = array<i32: 0>} : vector<16x16xi32>
    %c2_i32 = arith.constant 2 : i32
    %c0_i32 = arith.constant 0 : i32
    %2 = arith.cmpi eq, %c2_i32, %c0_i32 : i32
    %c1_i32 = arith.constant 1 : i32
    %3 = arith.select %2, %c1_i32, %c2_i32 : i32
    %4 = vector.broadcast %3 : i32 to vector<16x16xi32>
    %5 = arith.remsi %1, %4 : vector<16x16xi32>
    %c0_i32_1 = arith.constant 0 : i32
    %6 = vector.broadcast %c0_i32_1 : i32 to vector<16x16xi32>
    %7 = arith.cmpi ne, %5, %6 : vector<16x16xi32>
    %c0_i32_2 = arith.constant 0 : i32
    %8 = vector.broadcast %c0_i32_2 : i32 to vector<16x16xi32>
    %9 = arith.cmpi slt, %5, %8 : vector<16x16xi32>
    %c0_i32_3 = arith.constant 0 : i32
    %10 = arith.cmpi slt, %3, %c0_i32_3 : i32
    %11 = vector.broadcast %10 : i1 to vector<16x16xi1>
    %12 = vector.broadcast %11 : vector<16x16xi1> to vector<16x16xi1>
    %13 = arith.xori %9, %12 : vector<16x16xi1>
    %14 = arith.andi %13, %7 : vector<16x16xi1>
    %15 = vector.broadcast %3 : i32 to vector<16x16xi32>
    %16 = arith.addi %5, %15 : vector<16x16xi32>
    %17 = arith.select %14, %16, %5 : vector<16x16xi1>, vector<16x16xi32>
    %18 = tpu.iota {dimensions = array<i32: 1>} : vector<16x16xi32>
    %c2_i32_4 = arith.constant 2 : i32
    %c0_i32_5 = arith.constant 0 : i32
    %19 = arith.cmpi eq, %c2_i32_4, %c0_i32_5 : i32
    %c1_i32_6 = arith.constant 1 : i32
    %20 = arith.select %19, %c1_i32_6, %c2_i32_4 : i32
    %21 = vector.broadcast %20 : i32 to vector<16x16xi32>
    %22 = arith.remsi %18, %21 : vector<16x16xi32>
    %c0_i32_7 = arith.constant 0 : i32
    %23 = vector.broadcast %c0_i32_7 : i32 to vector<16x16xi32>
    %24 = arith.cmpi ne, %22, %23 : vector<16x16xi32>
    %c0_i32_8 = arith.constant 0 : i32
    %25 = vector.broadcast %c0_i32_8 : i32 to vector<16x16xi32>
    %26 = arith.cmpi slt, %22, %25 : vector<16x16xi32>
    %c0_i32_9 = arith.constant 0 : i32
    %27 = arith.cmpi slt, %20, %c0_i32_9 : i32
    %28 = vector.broadcast %27 : i1 to vector<16x16xi1>
    %29 = vector.broadcast %28 : vector<16x16xi1> to vector<16x16xi1>
    %30 = arith.xori %26, %29 : vector<16x16xi1>
    %31 = arith.andi %30, %24 : vector<16x16xi1>
    %32 = vector.broadcast %20 : i32 to vector<16x16xi32>
    %33 = arith.addi %22, %32 : vector<16x16xi32>
    %34 = arith.select %31, %33, %22 : vector<16x16xi1>, vector<16x16xi32>
    %35 = arith.cmpi eq, %17, %34 : vector<16x16xi32>
    %cst = arith.constant 0.000000e+00 : f32
    %cst_10 = arith.constant -1.000000e+30 : f32
    %36 = vector.broadcast %cst : f32 to vector<16x16xf32>
    %37 = vector.broadcast %cst_10 : f32 to vector<16x16xf32>
    %38 = arith.select %35, %36, %37 : vector<16x16xi1>, vector<16x16xf32>
    %39 = tpu.iota {dimensions = array<i32: 0>} : vector<8x16xi32>
    %40 = tpu.iota {dimensions = array<i32: 1>} : vector<8x16xi32>
    %c2_i32_11 = arith.constant 2 : i32
    %41 = vector.broadcast %c2_i32_11 : i32 to vector<8x16xi32>
    %42 = arith.muli %39, %41 : vector<8x16xi32>
    %c1_i32_12 = arith.constant 1 : i32
    %43 = vector.broadcast %c1_i32_12 : i32 to vector<8x16xi32>
    %44 = arith.addi %42, %43 : vector<8x16xi32>
    %45 = arith.cmpi eq, %40, %44 : vector<8x16xi32>
    %46 = arith.extui %45 : vector<8x16xi1> to vector<8x16xi32>
    %47 = arith.sitofp %46 : vector<8x16xi32> to vector<8x16xf32>
    %c0_13 = arith.constant 0 : index
    %c0_14 = arith.constant 0 : index
    %c0_15 = arith.constant 0 : index
    %48 = vector.load %arg1[%c0_13, %c0_14, %c0_15] : memref<2x32x128xf32, #tpu.memory_space<vmem>>, vector<1x32x128xf32>
    %49 = vector.shape_cast %48 : vector<1x32x128xf32> to vector<32x128xf32>
    %c0_16 = arith.constant 0 : index
    %c0_17 = arith.constant 0 : index
    %c0_18 = arith.constant 0 : index
    %50 = vector.load %arg2[%c0_16, %c0_17, %c0_18] : memref<2x1x128xf32, #tpu.memory_space<vmem>>, vector<1x1x128xf32>
    %51 = vector.shape_cast %50 : vector<1x1x128xf32> to vector<1x128xf32>
    %c0_19 = arith.constant 0 : index
    %c0_20 = arith.constant 0 : index
    %c0_21 = arith.constant 0 : index
    %52 = vector.load %arg6[%c0_19, %c0_20, %c0_21] : memref<2x5x32xf32, #tpu.memory_space<vmem>>, vector<1x5x32xf32>
    %53 = vector.shape_cast %52 : vector<1x5x32xf32> to vector<5x32xf32>
    %cst_22 = arith.constant dense<0.000000e+00> : vector<16x128xf32>
    %54 = tpu.matmul %0, %49, %cst_22 {dimension_numbers = #tpu.dot_dimension_numbers<[1], [0], [0], [1], [0, 0, 1, 1], [], []>} : vector<16x32xf32>, vector<32x128xf32>, vector<16x128xf32> -> vector<16x128xf32>
    %55 = vector.broadcast %51 : vector<1x128xf32> to vector<16x128xf32>
    %56 = arith.addf %54, %55 : vector<16x128xf32>
    %57 = vector.extract_strided_slice %56 {offsets = [0, 0], sizes = [16, 32], strides = [1, 1]} : vector<16x128xf32> to vector<16x32xf32>
    %58 = vector.extract_strided_slice %56 {offsets = [0, 32], sizes = [16, 32], strides = [1, 1]} : vector<16x128xf32> to vector<16x32xf32>
    %59 = vector.extract_strided_slice %56 {offsets = [0, 64], sizes = [16, 32], strides = [1, 1]} : vector<16x128xf32> to vector<16x32xf32>
    %cst_23 = arith.constant dense<0.000000e+00> : vector<16x16xf32>
    %60 = tpu.matmul %57, %58, %cst_23 {dimension_numbers = #tpu.dot_dimension_numbers<[1], [1], [0], [0], [0, 0, 1, 0], [], []>} : vector<16x32xf32>, vector<16x32xf32>, vector<16x16xf32> -> vector<16x16xf32>
    %cst_24 = arith.constant 0.176776692 : f32
    %61 = vector.broadcast %cst_24 : f32 to vector<16x16xf32>
    %62 = arith.mulf %60, %61 : vector<16x16xf32>
    %63 = arith.addf %62, %38 : vector<16x16xf32>
    %cst_25 = arith.constant dense<0xFF800000> : vector<16xf32>
    %64 = vector.multi_reduction <maximumf>, %63, %cst_25 [1] : vector<16x16xf32> to vector<16xf32>
    %65 = vector.shape_cast %64 : vector<16xf32> to vector<16x1xf32>
    %66 = vector.broadcast %65 : vector<16x1xf32> to vector<16x16xf32>
    %67 = arith.subf %63, %66 : vector<16x16xf32>
    %68 = math.exp %67 : vector<16x16xf32>
    %cst_26 = arith.constant dense<0.000000e+00> : vector<16xf32>
    %69 = vector.multi_reduction <add>, %68, %cst_26 [1] : vector<16x16xf32> to vector<16xf32>
    %70 = vector.shape_cast %69 : vector<16xf32> to vector<16x1xf32>
    %71 = tpu.reciprocal %70 {approx = true} : vector<16x1xf32> -> vector<16x1xf32>
    %72 = vector.broadcast %71 : vector<16x1xf32> to vector<16x16xf32>
    %73 = arith.mulf %68, %72 : vector<16x16xf32>
    %cst_27 = arith.constant dense<0.000000e+00> : vector<16x32xf32>
    %74 = tpu.matmul %73, %59, %cst_27 {dimension_numbers = #tpu.dot_dimension_numbers<[1], [0], [0], [1], [0, 0, 1, 1], [], []>} : vector<16x16xf32>, vector<16x32xf32>, vector<16x32xf32> -> vector<16x32xf32>
    %75 = vector.extract_strided_slice %49 {offsets = [0, 96], sizes = [32, 32], strides = [1, 1]} : vector<32x128xf32> to vector<32x32xf32>
    %cst_28 = arith.constant dense<0.000000e+00> : vector<16x32xf32>
    %76 = tpu.matmul %74, %75, %cst_28 {dimension_numbers = #tpu.dot_dimension_numbers<[1], [0], [0], [1], [0, 0, 1, 1], [], []>} : vector<16x32xf32>, vector<32x32xf32>, vector<16x32xf32> -> vector<16x32xf32>
    %77 = vector.extract_strided_slice %51 {offsets = [0, 96], sizes = [1, 32], strides = [1, 1]} : vector<1x128xf32> to vector<1x32xf32>
    %78 = vector.broadcast %77 : vector<1x32xf32> to vector<16x32xf32>
    %79 = arith.addf %76, %78 : vector<16x32xf32>
    %80 = arith.addf %0, %79 : vector<16x32xf32>
    %cst_29 = arith.constant dense<0.000000e+00> : vector<16xf32>
    %81 = vector.multi_reduction <add>, %80, %cst_29 [1] : vector<16x32xf32> to vector<16xf32>
    %82 = vector.shape_cast %81 : vector<16xf32> to vector<16x1xf32>
    %cst_30 = arith.constant 3.200000e+01 : f32
    %83 = vector.broadcast %cst_30 : f32 to vector<16x1xf32>
    %84 = arith.divf %82, %83 : vector<16x1xf32>
    %85 = arith.mulf %80, %80 : vector<16x32xf32>
    %cst_31 = arith.constant dense<0.000000e+00> : vector<16xf32>
    %86 = vector.multi_reduction <add>, %85, %cst_31 [1] : vector<16x32xf32> to vector<16xf32>
    %87 = vector.shape_cast %86 : vector<16xf32> to vector<16x1xf32>
    %cst_32 = arith.constant 3.200000e+01 : f32
    %88 = vector.broadcast %cst_32 : f32 to vector<16x1xf32>
    %89 = arith.divf %87, %88 : vector<16x1xf32>
    %90 = arith.mulf %84, %84 : vector<16x1xf32>
    %91 = arith.subf %89, %90 : vector<16x1xf32>
    %92 = vector.broadcast %84 : vector<16x1xf32> to vector<16x32xf32>
    %93 = arith.subf %80, %92 : vector<16x32xf32>
    %cst_33 = arith.constant 9.99999974E-6 : f32
    %94 = vector.broadcast %cst_33 : f32 to vector<16x1xf32>
    %95 = arith.addf %91, %94 : vector<16x1xf32>
    %96 = math.rsqrt %95 : vector<16x1xf32>
    %97 = vector.broadcast %96 : vector<16x1xf32> to vector<16x32xf32>
    %98 = arith.mulf %93, %97 : vector<16x32xf32>
    %99 = vector.extract_strided_slice %53 {offsets = [0, 0], sizes = [1, 32], strides = [1, 1]} : vector<5x32xf32> to vector<1x32xf32>
    %100 = vector.broadcast %99 : vector<1x32xf32> to vector<16x32xf32>
    %101 = arith.mulf %98, %100 : vector<16x32xf32>
    %102 = vector.extract_strided_slice %53 {offsets = [1, 0], sizes = [1, 32], strides = [1, 1]} : vector<5x32xf32> to vector<1x32xf32>
    %103 = vector.broadcast %102 : vector<1x32xf32> to vector<16x32xf32>
    %104 = arith.addf %101, %103 : vector<16x32xf32>
    %c0_34 = arith.constant 0 : index
    %c0_35 = arith.constant 0 : index
    %c0_36 = arith.constant 0 : index
    %105 = vector.load %arg3[%c0_34, %c0_35, %c0_36] : memref<2x32x512xf32, #tpu.memory_space<vmem>>, vector<1x32x512xf32>
    %106 = vector.shape_cast %105 : vector<1x32x512xf32> to vector<32x512xf32>
    %cst_37 = arith.constant dense<0.000000e+00> : vector<16x512xf32>
    %107 = tpu.matmul %104, %106, %cst_37 {dimension_numbers = #tpu.dot_dimension_numbers<[1], [0], [0], [1], [0, 0, 1, 1], [], []>} : vector<16x32xf32>, vector<32x512xf32>, vector<16x512xf32> -> vector<16x512xf32>
    %c0_38 = arith.constant 0 : index
    %c0_39 = arith.constant 0 : index
    %c0_40 = arith.constant 0 : index
    %108 = vector.load %arg4[%c0_38, %c0_39, %c0_40] : memref<2x1x512xf32, #tpu.memory_space<vmem>>, vector<1x1x512xf32>
    %109 = vector.shape_cast %108 : vector<1x1x512xf32> to vector<1x512xf32>
    %110 = vector.broadcast %109 : vector<1x512xf32> to vector<16x512xf32>
    %111 = arith.addf %107, %110 : vector<16x512xf32>
    %cst_41 = arith.constant 0.000000e+00 : f32
    %112 = vector.broadcast %cst_41 : f32 to vector<16x512xf32>
    %113 = arith.maximumf %111, %112 : vector<16x512xf32>
    %c0_42 = arith.constant 0 : index
    %c0_43 = arith.constant 0 : index
    %c0_44 = arith.constant 0 : index
    %114 = vector.load %arg5[%c0_42, %c0_43, %c0_44] : memref<2x32x512xf32, #tpu.memory_space<vmem>>, vector<1x32x512xf32>
    %115 = vector.shape_cast %114 : vector<1x32x512xf32> to vector<32x512xf32>
    %cst_45 = arith.constant dense<0.000000e+00> : vector<16x32xf32>
    %116 = tpu.matmul %113, %115, %cst_45 {dimension_numbers = #tpu.dot_dimension_numbers<[1], [1], [0], [0], [0, 0, 1, 0], [], []>} : vector<16x512xf32>, vector<32x512xf32>, vector<16x32xf32> -> vector<16x32xf32>
    %117 = vector.extract_strided_slice %53 {offsets = [4, 0], sizes = [1, 32], strides = [1, 1]} : vector<5x32xf32> to vector<1x32xf32>
    %118 = vector.broadcast %117 : vector<1x32xf32> to vector<16x32xf32>
    %119 = arith.addf %116, %118 : vector<16x32xf32>
    %120 = arith.addf %104, %119 : vector<16x32xf32>
    %cst_46 = arith.constant dense<0.000000e+00> : vector<16xf32>
    %121 = vector.multi_reduction <add>, %120, %cst_46 [1] : vector<16x32xf32> to vector<16xf32>
    %122 = vector.shape_cast %121 : vector<16xf32> to vector<16x1xf32>
    %cst_47 = arith.constant 3.200000e+01 : f32
    %123 = vector.broadcast %cst_47 : f32 to vector<16x1xf32>
    %124 = arith.divf %122, %123 : vector<16x1xf32>
    %125 = arith.mulf %120, %120 : vector<16x32xf32>
    %cst_48 = arith.constant dense<0.000000e+00> : vector<16xf32>
    %126 = vector.multi_reduction <add>, %125, %cst_48 [1] : vector<16x32xf32> to vector<16xf32>
    %127 = vector.shape_cast %126 : vector<16xf32> to vector<16x1xf32>
    %cst_49 = arith.constant 3.200000e+01 : f32
    %128 = vector.broadcast %cst_49 : f32 to vector<16x1xf32>
    %129 = arith.divf %127, %128 : vector<16x1xf32>
    %130 = arith.mulf %124, %124 : vector<16x1xf32>
    %131 = arith.subf %129, %130 : vector<16x1xf32>
    %132 = vector.broadcast %124 : vector<16x1xf32> to vector<16x32xf32>
    %133 = arith.subf %120, %132 : vector<16x32xf32>
    %cst_50 = arith.constant 9.99999974E-6 : f32
    %134 = vector.broadcast %cst_50 : f32 to vector<16x1xf32>
    %135 = arith.addf %131, %134 : vector<16x1xf32>
    %136 = math.rsqrt %135 : vector<16x1xf32>
    %137 = vector.broadcast %136 : vector<16x1xf32> to vector<16x32xf32>
    %138 = arith.mulf %133, %137 : vector<16x32xf32>
    %139 = vector.extract_strided_slice %53 {offsets = [2, 0], sizes = [1, 32], strides = [1, 1]} : vector<5x32xf32> to vector<1x32xf32>
    %140 = vector.broadcast %139 : vector<1x32xf32> to vector<16x32xf32>
    %141 = arith.mulf %138, %140 : vector<16x32xf32>
    %142 = vector.extract_strided_slice %53 {offsets = [3, 0], sizes = [1, 32], strides = [1, 1]} : vector<5x32xf32> to vector<1x32xf32>
    %143 = vector.broadcast %142 : vector<1x32xf32> to vector<16x32xf32>
    %144 = arith.addf %141, %143 : vector<16x32xf32>
    %c1 = arith.constant 1 : index
    %c0_51 = arith.constant 0 : index
    %c0_52 = arith.constant 0 : index
    %145 = vector.load %arg1[%c1, %c0_51, %c0_52] : memref<2x32x128xf32, #tpu.memory_space<vmem>>, vector<1x32x128xf32>
    %146 = vector.shape_cast %145 : vector<1x32x128xf32> to vector<32x128xf32>
    %c1_53 = arith.constant 1 : index
    %c0_54 = arith.constant 0 : index
    %c0_55 = arith.constant 0 : index
    %147 = vector.load %arg2[%c1_53, %c0_54, %c0_55] : memref<2x1x128xf32, #tpu.memory_space<vmem>>, vector<1x1x128xf32>
    %148 = vector.shape_cast %147 : vector<1x1x128xf32> to vector<1x128xf32>
    %c1_56 = arith.constant 1 : index
    %c0_57 = arith.constant 0 : index
    %c0_58 = arith.constant 0 : index
    %149 = vector.load %arg6[%c1_56, %c0_57, %c0_58] : memref<2x5x32xf32, #tpu.memory_space<vmem>>, vector<1x5x32xf32>
    %150 = vector.shape_cast %149 : vector<1x5x32xf32> to vector<5x32xf32>
    %cst_59 = arith.constant dense<0.000000e+00> : vector<16x128xf32>
    %151 = tpu.matmul %144, %146, %cst_59 {dimension_numbers = #tpu.dot_dimension_numbers<[1], [0], [0], [1], [0, 0, 1, 1], [], []>} : vector<16x32xf32>, vector<32x128xf32>, vector<16x128xf32> -> vector<16x128xf32>
    %152 = vector.broadcast %148 : vector<1x128xf32> to vector<16x128xf32>
    %153 = arith.addf %151, %152 : vector<16x128xf32>
    %154 = vector.extract_strided_slice %153 {offsets = [0, 0], sizes = [16, 32], strides = [1, 1]} : vector<16x128xf32> to vector<16x32xf32>
    %155 = vector.extract_strided_slice %153 {offsets = [0, 32], sizes = [16, 32], strides = [1, 1]} : vector<16x128xf32> to vector<16x32xf32>
    %156 = vector.extract_strided_slice %153 {offsets = [0, 64], sizes = [16, 32], strides = [1, 1]} : vector<16x128xf32> to vector<16x32xf32>
    %cst_60 = arith.constant dense<0.000000e+00> : vector<16x16xf32>
    %157 = tpu.matmul %154, %155, %cst_60 {dimension_numbers = #tpu.dot_dimension_numbers<[1], [1], [0], [0], [0, 0, 1, 0], [], []>} : vector<16x32xf32>, vector<16x32xf32>, vector<16x16xf32> -> vector<16x16xf32>
    %cst_61 = arith.constant 0.176776692 : f32
    %158 = vector.broadcast %cst_61 : f32 to vector<16x16xf32>
    %159 = arith.mulf %157, %158 : vector<16x16xf32>
    %160 = arith.addf %159, %38 : vector<16x16xf32>
    %cst_62 = arith.constant dense<0xFF800000> : vector<16xf32>
    %161 = vector.multi_reduction <maximumf>, %160, %cst_62 [1] : vector<16x16xf32> to vector<16xf32>
    %162 = vector.shape_cast %161 : vector<16xf32> to vector<16x1xf32>
    %163 = vector.broadcast %162 : vector<16x1xf32> to vector<16x16xf32>
    %164 = arith.subf %160, %163 : vector<16x16xf32>
    %165 = math.exp %164 : vector<16x16xf32>
    %cst_63 = arith.constant dense<0.000000e+00> : vector<16xf32>
    %166 = vector.multi_reduction <add>, %165, %cst_63 [1] : vector<16x16xf32> to vector<16xf32>
    %167 = vector.shape_cast %166 : vector<16xf32> to vector<16x1xf32>
    %168 = tpu.reciprocal %167 {approx = true} : vector<16x1xf32> -> vector<16x1xf32>
    %169 = vector.broadcast %168 : vector<16x1xf32> to vector<16x16xf32>
    %170 = arith.mulf %165, %169 : vector<16x16xf32>
    %cst_64 = arith.constant dense<0.000000e+00> : vector<16x32xf32>
    %171 = tpu.matmul %170, %156, %cst_64 {dimension_numbers = #tpu.dot_dimension_numbers<[1], [0], [0], [1], [0, 0, 1, 1], [], []>} : vector<16x16xf32>, vector<16x32xf32>, vector<16x32xf32> -> vector<16x32xf32>
    %172 = vector.extract_strided_slice %146 {offsets = [0, 96], sizes = [32, 32], strides = [1, 1]} : vector<32x128xf32> to vector<32x32xf32>
    %cst_65 = arith.constant dense<0.000000e+00> : vector<16x32xf32>
    %173 = tpu.matmul %171, %172, %cst_65 {dimension_numbers = #tpu.dot_dimension_numbers<[1], [0], [0], [1], [0, 0, 1, 1], [], []>} : vector<16x32xf32>, vector<32x32xf32>, vector<16x32xf32> -> vector<16x32xf32>
    %174 = vector.extract_strided_slice %148 {offsets = [0, 96], sizes = [1, 32], strides = [1, 1]} : vector<1x128xf32> to vector<1x32xf32>
    %175 = vector.broadcast %174 : vector<1x32xf32> to vector<16x32xf32>
    %176 = arith.addf %173, %175 : vector<16x32xf32>
    %177 = arith.addf %144, %176 : vector<16x32xf32>
    %cst_66 = arith.constant dense<0.000000e+00> : vector<16xf32>
    %178 = vector.multi_reduction <add>, %177, %cst_66 [1] : vector<16x32xf32> to vector<16xf32>
    %179 = vector.shape_cast %178 : vector<16xf32> to vector<16x1xf32>
    %cst_67 = arith.constant 3.200000e+01 : f32
    %180 = vector.broadcast %cst_67 : f32 to vector<16x1xf32>
    %181 = arith.divf %179, %180 : vector<16x1xf32>
    %182 = arith.mulf %177, %177 : vector<16x32xf32>
    %cst_68 = arith.constant dense<0.000000e+00> : vector<16xf32>
    %183 = vector.multi_reduction <add>, %182, %cst_68 [1] : vector<16x32xf32> to vector<16xf32>
    %184 = vector.shape_cast %183 : vector<16xf32> to vector<16x1xf32>
    %cst_69 = arith.constant 3.200000e+01 : f32
    %185 = vector.broadcast %cst_69 : f32 to vector<16x1xf32>
    %186 = arith.divf %184, %185 : vector<16x1xf32>
    %187 = arith.mulf %181, %181 : vector<16x1xf32>
    %188 = arith.subf %186, %187 : vector<16x1xf32>
    %189 = vector.broadcast %181 : vector<16x1xf32> to vector<16x32xf32>
    %190 = arith.subf %177, %189 : vector<16x32xf32>
    %cst_70 = arith.constant 9.99999974E-6 : f32
    %191 = vector.broadcast %cst_70 : f32 to vector<16x1xf32>
    %192 = arith.addf %188, %191 : vector<16x1xf32>
    %193 = math.rsqrt %192 : vector<16x1xf32>
    %194 = vector.broadcast %193 : vector<16x1xf32> to vector<16x32xf32>
    %195 = arith.mulf %190, %194 : vector<16x32xf32>
    %196 = vector.extract_strided_slice %150 {offsets = [0, 0], sizes = [1, 32], strides = [1, 1]} : vector<5x32xf32> to vector<1x32xf32>
    %197 = vector.broadcast %196 : vector<1x32xf32> to vector<16x32xf32>
    %198 = arith.mulf %195, %197 : vector<16x32xf32>
    %199 = vector.extract_strided_slice %150 {offsets = [1, 0], sizes = [1, 32], strides = [1, 1]} : vector<5x32xf32> to vector<1x32xf32>
    %200 = vector.broadcast %199 : vector<1x32xf32> to vector<16x32xf32>
    %201 = arith.addf %198, %200 : vector<16x32xf32>
    %c1_71 = arith.constant 1 : index
    %c0_72 = arith.constant 0 : index
    %c0_73 = arith.constant 0 : index
    %202 = vector.load %arg3[%c1_71, %c0_72, %c0_73] : memref<2x32x512xf32, #tpu.memory_space<vmem>>, vector<1x32x512xf32>
    %203 = vector.shape_cast %202 : vector<1x32x512xf32> to vector<32x512xf32>
    %cst_74 = arith.constant dense<0.000000e+00> : vector<16x512xf32>
    %204 = tpu.matmul %201, %203, %cst_74 {dimension_numbers = #tpu.dot_dimension_numbers<[1], [0], [0], [1], [0, 0, 1, 1], [], []>} : vector<16x32xf32>, vector<32x512xf32>, vector<16x512xf32> -> vector<16x512xf32>
    %c1_75 = arith.constant 1 : index
    %c0_76 = arith.constant 0 : index
    %c0_77 = arith.constant 0 : index
    %205 = vector.load %arg4[%c1_75, %c0_76, %c0_77] : memref<2x1x512xf32, #tpu.memory_space<vmem>>, vector<1x1x512xf32>
    %206 = vector.shape_cast %205 : vector<1x1x512xf32> to vector<1x512xf32>
    %207 = vector.broadcast %206 : vector<1x512xf32> to vector<16x512xf32>
    %208 = arith.addf %204, %207 : vector<16x512xf32>
    %cst_78 = arith.constant 0.000000e+00 : f32
    %209 = vector.broadcast %cst_78 : f32 to vector<16x512xf32>
    %210 = arith.maximumf %208, %209 : vector<16x512xf32>
    %c1_79 = arith.constant 1 : index
    %c0_80 = arith.constant 0 : index
    %c0_81 = arith.constant 0 : index
    %211 = vector.load %arg5[%c1_79, %c0_80, %c0_81] : memref<2x32x512xf32, #tpu.memory_space<vmem>>, vector<1x32x512xf32>
    %212 = vector.shape_cast %211 : vector<1x32x512xf32> to vector<32x512xf32>
    %cst_82 = arith.constant dense<0.000000e+00> : vector<16x32xf32>
    %213 = tpu.matmul %210, %212, %cst_82 {dimension_numbers = #tpu.dot_dimension_numbers<[1], [1], [0], [0], [0, 0, 1, 0], [], []>} : vector<16x512xf32>, vector<32x512xf32>, vector<16x32xf32> -> vector<16x32xf32>
    %214 = vector.extract_strided_slice %150 {offsets = [4, 0], sizes = [1, 32], strides = [1, 1]} : vector<5x32xf32> to vector<1x32xf32>
    %215 = vector.broadcast %214 : vector<1x32xf32> to vector<16x32xf32>
    %216 = arith.addf %213, %215 : vector<16x32xf32>
    %217 = arith.addf %201, %216 : vector<16x32xf32>
    %cst_83 = arith.constant dense<0.000000e+00> : vector<16xf32>
    %218 = vector.multi_reduction <add>, %217, %cst_83 [1] : vector<16x32xf32> to vector<16xf32>
    %219 = vector.shape_cast %218 : vector<16xf32> to vector<16x1xf32>
    %cst_84 = arith.constant 3.200000e+01 : f32
    %220 = vector.broadcast %cst_84 : f32 to vector<16x1xf32>
    %221 = arith.divf %219, %220 : vector<16x1xf32>
    %222 = arith.mulf %217, %217 : vector<16x32xf32>
    %cst_85 = arith.constant dense<0.000000e+00> : vector<16xf32>
    %223 = vector.multi_reduction <add>, %222, %cst_85 [1] : vector<16x32xf32> to vector<16xf32>
    %224 = vector.shape_cast %223 : vector<16xf32> to vector<16x1xf32>
    %cst_86 = arith.constant 3.200000e+01 : f32
    %225 = vector.broadcast %cst_86 : f32 to vector<16x1xf32>
    %226 = arith.divf %224, %225 : vector<16x1xf32>
    %227 = arith.mulf %221, %221 : vector<16x1xf32>
    %228 = arith.subf %226, %227 : vector<16x1xf32>
    %229 = vector.broadcast %221 : vector<16x1xf32> to vector<16x32xf32>
    %230 = arith.subf %217, %229 : vector<16x32xf32>
    %cst_87 = arith.constant 9.99999974E-6 : f32
    %231 = vector.broadcast %cst_87 : f32 to vector<16x1xf32>
    %232 = arith.addf %228, %231 : vector<16x1xf32>
    %233 = math.rsqrt %232 : vector<16x1xf32>
    %234 = vector.broadcast %233 : vector<16x1xf32> to vector<16x32xf32>
    %235 = arith.mulf %230, %234 : vector<16x32xf32>
    %236 = vector.extract_strided_slice %150 {offsets = [2, 0], sizes = [1, 32], strides = [1, 1]} : vector<5x32xf32> to vector<1x32xf32>
    %237 = vector.broadcast %236 : vector<1x32xf32> to vector<16x32xf32>
    %238 = arith.mulf %235, %237 : vector<16x32xf32>
    %239 = vector.extract_strided_slice %150 {offsets = [3, 0], sizes = [1, 32], strides = [1, 1]} : vector<5x32xf32> to vector<1x32xf32>
    %240 = vector.broadcast %239 : vector<1x32xf32> to vector<16x32xf32>
    %241 = arith.addf %238, %240 : vector<16x32xf32>
    %cst_88 = arith.constant dense<0.000000e+00> : vector<8x32xf32>
    %242 = tpu.matmul %47, %241, %cst_88 {dimension_numbers = #tpu.dot_dimension_numbers<[1], [0], [0], [1], [0, 0, 1, 1], [], []>} : vector<8x16xf32>, vector<16x32xf32>, vector<8x32xf32> -> vector<8x32xf32>
    %c0_89 = arith.constant 0 : index
    %c0_90 = arith.constant 0 : index
    %243 = vector.load %arg7[%c0_89, %c0_90] : memref<32x128xf32, #tpu.memory_space<vmem>>, vector<32x128xf32>
    %cst_91 = arith.constant dense<0.000000e+00> : vector<8x128xf32>
    %244 = tpu.matmul %242, %243, %cst_91 {dimension_numbers = #tpu.dot_dimension_numbers<[1], [0], [0], [1], [0, 0, 1, 1], [], []>} : vector<8x32xf32>, vector<32x128xf32>, vector<8x128xf32> -> vector<8x128xf32>
    %c0_92 = arith.constant 0 : index
    %c0_93 = arith.constant 0 : index
    %245 = vector.load %arg8[%c0_92, %c0_93] : memref<1x128xf32, #tpu.memory_space<vmem>>, vector<1x128xf32>
    %246 = vector.broadcast %245 : vector<1x128xf32> to vector<8x128xf32>
    %247 = arith.addf %244, %246 : vector<8x128xf32>
    %c0_94 = arith.constant 0 : index
    %c0_95 = arith.constant 0 : index
    %248 = vector.load %arg9[%c0_94, %c0_95] : memref<8x128xf32, #tpu.memory_space<vmem>>, vector<8x128xf32>
    tpu.vector_store %arg9[%c0_94, %c0_95], %247 {strides = array<i32>} : memref<8x128xf32, #tpu.memory_space<vmem>>, vector<8x128xf32>,
    return
  }
}

</mosaic_0001>

<bundles_post_ra>
// kernel: transformer_base_forward.1
= control target key start
LH: loop header
LB: loop body
LE: loop exit
PB: predicated region body
PF: predicated region fallthrough
CT: control target
= control target key end

     0   :  { %14 = vsyncpa [#allocation3], 0  ;;  %s2955_s0 = inlined_call_operand.vmem [shape: f32[16,32], index: 0, kind: input, shape index: {}]   ;;  %s2956_s1 = inlined_call_operand.hbm [shape: f32[2,32,128], index: 1, kind: input, shape index: {}]   ;;  %s2957_s2 = inlined_call_operand.vmem [shape: f32[2,1,128], index: 2, kind: input, shape index: {}]   ;;  %s2958_s3 = inlined_call_operand.hbm [shape: f32[2,32,512], index: 3, kind: input, shape index: {}]   ;;  %s2959_s4 = inlined_call_operand.hbm [shape: f32[2,1,512], index: 4, kind: input, shape index: {}]   ;;  %s2960_s5 = inlined_call_operand.hbm [shape: f32[2,32,512], index: 5, kind: input, shape index: {}]   ;;  %s2961_s6 = inlined_call_operand.vmem [shape: f32[2,5,32], index: 6, kind: input, shape index: {}]   ;;  %s2962_s7 = inlined_call_operand.vmem [shape: f32[32,128], index: 7, kind: input, shape index: {}]   ;;  %s2963_s8 = inlined_call_operand.vmem [shape: f32[1,128], index: 8, kind: input, shape index: {}]   ;;  %s2964_s9 = inlined_call_operand.hbm [shape: f32[8,128], index: 9, kind: output, shape index: {}]  }
   0x1   :  { %15 = vsyncpa [#allocation6], 0 }
   0x2   :  { %16 = vsyncpa [#allocation9], 0 }
   0x3   :  { %17 = vsyncpa [#allocation4], 0  ;;  %s2547_s30 = smov [#allocation5]   ;;  %s2429_s13 = scalar_lea.hbm %s2958_s3, 4096 }
   0x4   :  { %s39_s10 = sshll.u32 %s2547_s30, 4  ;;  %p2430_p0 = scmp.ne.s32.totalorder %s2958_s3, %s2429_s13  ;;  %s40_s10 = int_to_ptr.vmem [resolvable:$true] %s39_s10 }
   0x5   :  { %p2433_p1 = scmp.lt.u32.totalorder %s2429_s13, %s2958_s3 }
   0x7   :  { %p2435_p2 = pnand %p2433_p1, %p2430_p0 }
   0x9   :  { %2438 = shalt.err (!%p2435_p2)
}
   0xa   :  { %s2439_s18 = scalar_lea.vmem %s40_s10, 4096  ;;  %p2444_p4 = scmp.lt.s32.totalorder %s40_s10, %s40_s10 }
   0xb   :  { %p2440_p3 = scmp.ne.s32.totalorder %s40_s10, %s2439_s18  ;;  %p2445_p5 = scmp.lt.s32.totalorder %s2439_s18, %s2439_s18 }
   0xd   :  { %p2446_p6 = por %p2445_p5, %p2444_p4 }
   0xf   :  { %p2447_p7 = pnand %p2446_p6, %p2440_p3 }
  0x11   :  { %2450 = shalt.err (!%p2447_p7)
}
  0x12   :  { %s2548_s19 = smov 512   ;;  %s2549_s20 = smov 32  }
  0x13   :  { %45 = dma.hbm_to_vmem [thread:$0]  %s2958_s3, 4096, %s40_s10, [#allocation6], %s2548_s19, %s2548_s19, %s2549_s20  }
  0x14   :  { %s2550_s23 = smov [#allocation2]   ;;  %s2451_s27 = scalar_lea.hbm %s2956_s1, 1024 }
  0x15   :  { %s25_s24 = sshll.u32 %s2550_s23, 4  ;;  %p2452_p8 = scmp.ne.s32.totalorder %s2956_s1, %s2451_s27  ;;  %s26_s24 = int_to_ptr.vmem [resolvable:$true] %s25_s24 }
  0x16   :  { %p2455_p9 = scmp.lt.u32.totalorder %s2451_s27, %s2956_s1 }
  0x18   :  { %p2457_p10 = pnand %p2455_p9, %p2452_p8 }
  0x1a   :  { %2460 = shalt.err (!%p2457_p10)
}
  0x1b   :  { %s2461_s12 = scalar_lea.vmem %s26_s24, 1024  ;;  %p2466_p12 = scmp.lt.s32.totalorder %s26_s24, %s26_s24 }
  0x1c   :  { %p2462_p11 = scmp.ne.s32.totalorder %s26_s24, %s2461_s12  ;;  %p2467_p13 = scmp.lt.s32.totalorder %s2461_s12, %s2461_s12 }
  0x1e   :  { %p2468_p0 = por %p2467_p13, %p2466_p12 }
  0x20   :  { %p2469_p1 = pnand %p2468_p0, %p2462_p11 }
  0x22   :  { %2472 = shalt.err (!%p2469_p1)
}
  0x23   :  { %s2551_s3 = smov 128   ;;  %s2552_s10 = smov 8  }
  0x24   :  { %31 = dma.hbm_to_vmem [thread:$0]  %s2956_s1, 1024, %s26_s24, [#allocation3], %s2551_s3, %s2551_s3, %s2552_s10  }
  0x25   :  { %s2553_s15 = smov [#allocation7]   ;;  %s2473_s21 = scalar_lea.hbm %s2959_s4, 128 }
  0x26   :  { %s51_s16 = sshll.u32 %s2553_s15, 4  ;;  %p2474_p2 = scmp.ne.s32.totalorder %s2959_s4, %s2473_s21  ;;  %s52_s16 = int_to_ptr.vmem [resolvable:$true] %s51_s16 }
  0x27   :  { %p2477_p3 = scmp.lt.u32.totalorder %s2473_s21, %s2959_s4 }
  0x29   :  { %p2479_p4 = pnand %p2477_p3, %p2474_p2 }
  0x2b   :  { %2482 = shalt.err (!%p2479_p4)
}
  0x2c   :  { %s2483_s27 = scalar_lea.vmem %s52_s16, 128  ;;  %p2488_p6 = scmp.lt.s32.totalorder %s52_s16, %s52_s16 }
  0x2d   :  { %p2484_p5 = scmp.ne.s32.totalorder %s52_s16, %s2483_s27  ;;  %p2489_p7 = scmp.lt.s32.totalorder %s2483_s27, %s2483_s27 }
  0x2f   :  { %p2490_p8 = por %p2489_p7, %p2488_p6 }
  0x31   :  { %p2491_p9 = pnand %p2490_p8, %p2484_p5 }
  0x33   :  { %2494 = shalt.err (!%p2491_p9)
}
  0x34   :  { %s2554_s1 = smov 64   ;;  %s2555_s24 = smov 4  }
  0x35   :  { %57 = dma.hbm_to_vmem [thread:$0]  %s2959_s4, 128, %s52_s16, [#allocation6], %s2554_s1, %s2554_s1, %s2555_s24  }
  0x36   :  { %s2556_s30 = smov [#allocation8]   ;;  %s2495_s10 = scalar_lea.hbm %s2960_s5, 4096 }
  0x37   :  { %s63_s11 = sshll.u32 %s2556_s30, 4  ;;  %p2496_p10 = scmp.ne.s32.totalorder %s2960_s5, %s2495_s10  ;;  %s64_s11 = int_to_ptr.vmem [resolvable:$true] %s63_s11 }
  0x38   :  { %p2499_p11 = scmp.lt.u32.totalorder %s2495_s10, %s2960_s5 }
  0x3a   :  { %p2501_p12 = pnand %p2499_p11, %p2496_p10 }
  0x3c   :  { %2504 = shalt.err (!%p2501_p12)
}
  0x3d   :  { %s2505_s18 = scalar_lea.vmem %s64_s11, 4096  ;;  %p2510_p0 = scmp.lt.s32.totalorder %s64_s11, %s64_s11 }
  0x3e   :  { %p2506_p13 = scmp.ne.s32.totalorder %s64_s11, %s2505_s18  ;;  %p2511_p1 = scmp.lt.s32.totalorder %s2505_s18, %s2505_s18 }
  0x40   :  { %p2512_p2 = por %p2511_p1, %p2510_p0 }
  0x42   :  { %p2513_p3 = pnand %p2512_p2, %p2506_p13 }
  0x44   :  { %2516 = shalt.err (!%p2513_p3)
}
  0x45   :  { %69 = dma.hbm_to_vmem [thread:$0]  %s2960_s5, 4096, %s64_s11, [#allocation9], %s2548_s19, %s2548_s19, %s2549_s20  }
  0x46   :  { %2539 = dma.done.wait [#allocation3], 1024  }
  0x47   :  { %2540 = vsyncadd [#allocation3], 4294966272 }
  0x48   :  { %2541 = dma.done.wait [#allocation6], 4224  }
  0x49   :  { %2542 = vsyncadd [#allocation6], 4294963072 }
  0x4a   :  { %2543 = dma.done.wait [#allocation9], 4096  }
  0x4b   :  { %2544 = vsyncadd [#allocation9], 4294963200  ;;  %vm152_vm0 = vcmask 261120   ;;  %v2669_v0 = vld [vmem:[#allocation2] sm:$0xff]  ;;  %v2671_v1 = vld [vmem:[#allocation2 + $0x8] sm:$0xff]  ;;  %s2557_s26 = smov 96   ;;  %v90_v19 = vlaneseq }
  0x4c   :  { %v2673_v2 = vld [vmem:[#allocation2 + $0x10] sm:$0xff]  ;;  %v2216_v3 = vpack.c.bf16 %v2671_v1, %v2669_v0  ;;  %v2677_v4 = vld [vmem:[#allocation2 + $0x18] sm:$0xff]  ;;  %v2682_v5 = vld [vmem:[%s2955_s0] sm:$0xff]  ;;  %v2558_v27 = vmov -1e+30   ;;  %vm327_vm4 = vcmask 130048   ;;  %v2367_v47 = vpack.i.bf16 %v2671_v1, %v2669_v0 }
  0x4d   :  { %v2220_v6 = vpack.c.bf16 %v2677_v4, %v2673_v2  ;;  %2134 = vmatprep.mubr.msk.f32.mxu0 %vm152_vm0, %v2682_v5  ;;  %v2691_v7 = vld [vmem:[%s2955_s0 + $0x8] sm:$0xff]  ;;  %v2043_v8 = vld [vmem:[%s2957_s2] ss:$0 sm:$0xff]  ;;  %vm2702_vm1 = vmpackc.low %vm152_vm0, %vm152_vm0  ;;  %v2711_v20 = vshrl.u32 %v90_v19, 7  ;;  %v2714_v22 = vand.u32 127, %v90_v19  ;;  %v2372_v48 = vpack.i.bf16 %v2677_v4, %v2673_v2  ;;  %s2562_s14 = smov [#allocation10]  }
  0x4e   :  { %2217 = vmatprep.subr.bf16.mxu0 %v2216_v3  ;;  %v583_v19 = vld [vmem:[#allocation5 + $0x8] sm:$0xff]  ;;  %vm2561_vm5 = vmmov 0   ;;  %s2031_s15 = sshll.u32 %s2562_s14, 4  ;;  %s2032_s15 = int_to_ptr.vmem [resolvable:$true] %s2031_s15 }
  0x4f   :  { %2219 = vmatpush3.bf16.msra.mxu0 %v2216_v3  ;;  %v92_v21 = vadd.s32 8, %v2711_v20  ;;  %v123_v24 = vand.u32 1, %v2714_v22  ;;  %v97_v25 = vand.u32 1, %v2711_v20  ;;  %s2517_s17 = scalar_lea.vmem %s2032_s15, 128  ;;  %p2522_p5 = scmp.lt.s32.totalorder %s2032_s15, %s2032_s15 }
  0x50   :  { %2221 = vmatprep.subr.bf16.mxu0 %v2220_v6  ;;  %p2518_p4 = scmp.ne.s32.totalorder %s2032_s15, %s2517_s17  ;;  %p2523_p6 = scmp.lt.s32.totalorder %s2517_s17, %s2517_s17 }
  0x51   :  { %v104_v23 = vand.u32 1, %v92_v21  ;;  %vm131_vm3 = vcmp.eq.s32.totalorder %v97_v25, %v123_v24  ;;  %v587_v21 = vld [vmem:[#allocation5 + $0x28] sm:$0xff]  ;;  %v589_v25 = vld [vmem:[#allocation5 + $0x38] sm:$0xff] }
  0x52   :  { %v2720_v31 = vsel %vm131_vm3, 0.0, %v2558_v27  ;;  %p2524_p7 = por %p2523_p6, %p2522_p5 }
  0x53   :  { %2223 = vmatpush3.bf16.msra.mxu0 %v2220_v6  ;;  %vm132_vm2 = vcmp.eq.s32.totalorder %v104_v23, %v123_v24  ;;  %v585_v23 = vld [vmem:[#allocation5 + $0x18] sm:$0xff]  ;;  %v2242_v24 = vpack.c.bf16 %v587_v21, %v583_v19  ;;  %v797_v19 = vld [vmem:[#allocation8 + $0x48] sm:$0xff] }
  0x54   :  { %v2718_v28 = vsel %vm132_vm2, 0.0, %v2558_v27  ;;  %v586_v27 = vld [vmem:[#allocation5 + $0x20] sm:$0xff]  ;;  %p2525_p8 = pnand %p2524_p7, %p2518_p4 }
  0x55   :  { %2243 = vmatprep.subr.bf16.mxu0 %v2242_v24  ;;  %v799_v24 = vld [vmem:[#allocation8 + $0x58] sm:$0xff] }
  0x56   :  { %2135 = vmatmul.mubr.msk.f32.vlgmr.msra.gmra.mrb[0].mxu0 %vm152_vm0, %v2691_v7 }
 0x129   :  { %v2136_v9 = vpop.f32.mrb[0].mxu0 }
 0x12a   :  { %v231_v10 = vadd.f32 %v2136_v9, %v2043_v8  ;;  %v225_v11 = vpop.f32.mrb[1].mxu0 }
 0x12b   :  { %v226_v12 = vadd.f32 %v2043_v8, %v225_v11 }
 0x12d   :  { %2141 = vmatprep.mubr.msk.f32.mxu1 %vm152_vm0, %v226_v12  ;;  %v2357_v13 = vpack.i.bf16 %v231_v10, %v226_v12 }
 0x12f   :  { %2358 = vrot.lane.b32.xlu0 %v2357_v13, %s2557_s26 }
 0x1a1   :  { %v2359_v14 = vpop.permute.xlu0 %2358 }
 0x1a2   :  { %v2361_v15 = vunpack.i.h.bf16 %v2359_v14  ;;  %v2360_v16 = vunpack.i.l.bf16 %v2359_v14 }
 0x1a4   :  { %v2224_v18 = vpack.c.bf16 %v2361_v15, %v2360_v16 }
 0x1a6   :  { %2226 = vmatprep.subr.msk.bf16.mxu1 %vm2702_vm1, %v2224_v18 }
 0x1a7   :  { %2229 = vmatpush3.bf16.xpose.msk.msra.mxu1 %vm2702_vm1, %v2224_v18 }
 0x1ae   :  { %2142 = vmatmul.mubr.msk.f32.vlgmr.msra.gmra.mrb[0].mxu1 %vm152_vm0, %v231_v10 }
 0x281   :  { %v2143_v26 = vpop.f32.mrb[0].mxu1 }
 0x282   :  { %v324_v29 = vmul.f32 0.17677669, %v2143_v26  ;;  %v314_v30 = vpop.f32.mrb[1].mxu1  ;;  %v582_v26 = vld [vmem:[#allocation5] sm:$0xff] }
 0x283   :  { %v323_v32 = vmul.f32 0.17677669, %v314_v30  ;;  %v2244_v30 = vpack.c.bf16 %v586_v27, %v582_v26 }
 0x284   :  { %v326_v33 = vadd.f32 %v324_v29, %v2718_v28  ;;  %v2250_v29 = vpack.c.bf16 %v589_v25, %v585_v23  ;;  %v801_v23 = vld [vmem:[#allocation8 + $0x68] sm:$0xff]  ;;  %v803_v25 = vld [vmem:[#allocation8 + $0x78] sm:$0xff] }
 0x285   :  { %v325_v34 = vadd.f32 %v323_v32, %v2720_v31  ;;  %v584_v32 = vld [vmem:[#allocation5 + $0x10] sm:$0xff]  ;;  %2245 = vmatpush1.bf16.msra.mxu0 %v2244_v30 }
 0x286   :  { %v331_v35 = vsel %vm327_vm4, %v326_v33, -inf }
 0x287   :  { %332 = vmax.xlane.f32.xlu1 %v331_v35  ;;  %v328_v36 = vsel %vm327_vm4, %v325_v34, -inf  ;;  %v591_v35 = vld [vmem:[#allocation5 + $0x48] sm:$0xff] }
 0x288   :  { %329 = vmax.xlane.f32.xlu0 %v328_v36  ;;  %v595_v36 = vld [vmem:[#allocation5 + $0x68] sm:$0xff] }
 0x29e   :  { %453 = vrot.lane.b32.xlu0 %v2043_v8, %s2549_s20 }
 0x314   :  { %v333_v37 = vpop.xlane.xlu1 %332 }
 0x315   :  { %v335_v38 = vsub.f32 %v326_v33, %v333_v37  ;;  %v330_v39 = vpop.xlane.xlu0 %329  ;;  %v588_v33 = vld [vmem:[#allocation5 + $0x30] sm:$0xff]  ;;  %v593_v37 = vld [vmem:[#allocation5 + $0x58] sm:$0xff] }
 0x316   :  { %v334_v40 = vsub.f32 %v325_v34, %v330_v39  ;;  %v2252_v34 = vpack.c.bf16 %v588_v33, %v584_v32  ;;  %v597_v39 = vld [vmem:[#allocation5 + $0x78] sm:$0xff]  ;;  %v2262_v32 = vpack.c.bf16 %v801_v23, %v797_v19  ;;  %v2270_v33 = vpack.c.bf16 %v803_v25, %v799_v24 }
 0x317   :  { %v338_v41 = vmul.f32 1.442695, %v335_v38  ;;  %v2246_v38 = vpack.c.bf16 %v595_v36, %v591_v35  ;;  %v796_v36 = vld [vmem:[#allocation8 + $0x40] sm:$0xff] }
 0x318   :  { %v336_v42 = vmul.f32 1.442695, %v334_v40  ;;  %v590_v40 = vld [vmem:[#allocation5 + $0x40] sm:$0xff] }
 0x319   :  { %2397 = vpow2.f32 %v338_v41  ;;  %v454_v6 = vpop.permute.xlu0 %453  ;;  %v594_v41 = vld [vmem:[#allocation5 + $0x60] sm:$0xff]  ;;  %2247 = vmatprep.subr.bf16.mxu0 %v2246_v38  ;;  %v798_v38 = vld [vmem:[#allocation8 + $0x50] sm:$0xff] }
 0x31a   :  { %2399 = vpow2.f32 %v336_v42  ;;  %v2254_v42 = vpack.c.bf16 %v597_v39, %v593_v37  ;;  %v800_v37 = vld [vmem:[#allocation8 + $0x60] sm:$0xff] }
 0x31b   :  { %v2264_v39 = vpack.c.bf16 %v800_v37, %v796_v36 }
 0x323   :  { %v2398_v43 = vpop.eup %2397 }
 0x324   :  { %v343_v44 = vsel %vm327_vm4, %v2398_v43, 0.0  ;;  %v2400_v45 = vpop.eup %2399 }
 0x325   :  { %344 = vadd.xlane.f32.xlu1 %v343_v44  ;;  %v340_v46 = vsel %vm327_vm4, %v2400_v45, 0.0  ;;  %v592_v44 = vld [vmem:[#allocation5 + $0x50] sm:$0xff] }
 0x329   :  { %341 = vadd.xlane.f32.xlu1 %v340_v46  ;;  %v2559_v46 = vmov 0.0  }
 0x32a   :  { %690 = vmatprep.mubr.f32.mxu0 %v2559_v46 }
 0x33a   :  { %2363 = vrot.lane.b32.xlu1 %v2357_v13, %s2554_s1 }
 0x33e   :  { %2368 = vrot.lane.b32.xlu1 %v2367_v47, %s2549_s20 }
 0x342   :  { %2373 = vrot.lane.b32.xlu1 %v2372_v48, %s2549_s20  ;;  %v789_v48 = vld [vmem:[#allocation8 + $0x8] sm:$0xff] }
 0x3b2   :  { %v345_v49 = vpop.xlane.xlu1 %344 }
 0x3b3   :  { %2401 = vrcp.f32 %v345_v49  ;;  %v793_v49 = vld [vmem:[#allocation8 + $0x28] sm:$0xff] }
 0x3b6   :  { %v342_v50 = vpop.xlane.xlu1 %341 }
 0x3b7   :  { %2403 = vrcp.f32 %v342_v50  ;;  %v791_v50 = vld [vmem:[#allocation8 + $0x18] sm:$0xff] }
 0x3ba   :  { %v2364_v51 = vpop.permute.xlu1 %2363 }
 0x3bb   :  { %v2366_v52 = vunpack.i.h.bf16 %v2364_v51  ;;  %v2365_v53 = vunpack.i.l.bf16 %v2364_v51  ;;  %v2258_v51 = vpack.c.bf16 %v793_v49, %v789_v48 }
 0x3bd   :  { %v2230_v54 = vpack.c.bf16 %v2366_v52, %v2365_v53  ;;  %v2402_v58 = vpop.eup %2401  ;;  %v795_v52 = vld [vmem:[#allocation8 + $0x38] sm:$0xff] }
 0x3be   :  { %v2369_v55 = vpop.permute.xlu1 %2368  ;;  %v349_v63 = vmul.f32 %v2402_v58, %v2398_v43  ;;  %v2248_v43 = vpack.c.bf16 %v594_v41, %v590_v40  ;;  %v2266_v53 = vpack.c.bf16 %v795_v52, %v791_v50  ;;  %v802_v40 = vld [vmem:[#allocation8 + $0x70] sm:$0xff] }
 0x3bf   :  { %2231 = vmatprep.subr.bf16.mxu1 %v2230_v54  ;;  %v2371_v56 = vunpack.i.h.bf16 %v2369_v55  ;;  %v2370_v57 = vunpack.i.l.bf16 %v2369_v55  ;;  %v2272_v41 = vpack.c.bf16 %v802_v40, %v798_v38 }
 0x3c0   :  { %2233 = vmatpush3.bf16.msra.mxu1 %v2230_v54  ;;  %2249 = vmatpush1.bf16.msra.mxu0 %v2248_v43  ;;  %v598_v43 = vld [vmem:[#allocation7] sm:$0xf] }
 0x3c1   :  { %v2404_v59 = vpop.eup %2403  ;;  %v2234_v60 = vpack.c.bf16 %v2371_v56, %v2370_v57  ;;  %2259 = vmatprep.subr.bf16.mxu0 %v2258_v51 }
 0x3c2   :  { %v348_v61 = vmul.f32 %v2404_v59, %v2400_v45  ;;  %v2374_v62 = vpop.permute.xlu1 %2373  ;;  %v596_v45 = vld [vmem:[#allocation5 + $0x70] sm:$0xff] }
 0x3c3   :  { %v2376_v0 = vunpack.i.h.bf16 %v2374_v62  ;;  %v2375_v1 = vunpack.i.l.bf16 %v2374_v62  ;;  %2235 = vmatprep.subr.bf16.mxu1 %v2234_v60  ;;  %v2256_v47 = vpack.c.bf16 %v596_v45, %v592_v44  ;;  %v2793_v44 = vsub.s32 3, %v2711_v20 }
 0x3c4   :  { %2148 = vmatprep.mubr.msk.f32.mxu1 %vm327_vm4, %v348_v61 }
 0x3c5   :  { %2149 = vmatmul.mubr.msk.f32.vlgmr.msra.gmra.mrb[2].mxu1 %vm327_vm4, %v349_v63  ;;  %v2238_v2 = vpack.c.bf16 %v2376_v0, %v2375_v1  ;;  %v615_v49 = vrot.slane %v598_v43, %v2793_v44 }
 0x3c6   :  { %2237 = vmatpush3.bf16.msra.mxu1 %v2234_v60 }
 0x3c7   :  { %2239 = vmatprep.subr.bf16.mxu1 %v2238_v2 }
 0x3ca   :  { %2241 = vmatpush3.bf16.msra.mxu1 %v2238_v2 }
 0x3cb   :  { %2251 = vmatprep.subr.bf16.mxu1 %v2250_v29 }
 0x498   :  { %v2150_v3 = vpop.f32.mrb[2].mxu1 }
 0x499   :  { %v428_v4 = vpop.f32.mrb[3].mxu1 }
 0x49a   :  { %2159 = vmatprep.mubr.msk.f32.mxu1 %vm152_vm0, %v428_v4  ;;  %v2759_v4 = vsub.s32 0, %v2711_v20 }
 0x49b   :  { %2160 = vmatmul.mubr.msk.f32.vlgmr.msra.gmra.mrb[4].mxu1 %vm152_vm0, %v2150_v3 }
 0x49c   :  { %2253 = vmatpush1.bf16.msra.mxu1 %v2252_v34  ;;  %767 = vmatprep.mubr.f32.mxu1 %v2559_v46  ;;  %v603_v45 = vrot.slane %v598_v43, %v2759_v4 }
 0x49d   :  { %2255 = vmatprep.subr.bf16.mxu1 %v2254_v42  ;;  %v2790_v42 = vsub.s32 2, %v2711_v20 }
 0x4a0   :  { %2257 = vmatpush1.bf16.msra.mxu1 %v2256_v47  ;;  %v611_v47 = vrot.slane %v598_v43, %v2790_v42 }
 0x4a1   :  { %2267 = vmatprep.subr.bf16.mxu1 %v2266_v53 }
 0x56e   :  { %v2161_v8 = vpop.f32.mrb[4].mxu1 }
 0x56f   :  { %v528_v9 = vpop.f32.mrb[5].mxu1  ;;  %v534_v10 = vadd.f32 %v2161_v8, %v454_v6  ;;  %v2767_v8 = vsub.s32 1, %v2711_v20 }
 0x570   :  { %v529_v11 = vadd.f32 %v528_v9, %v454_v6  ;;  %v2764_v6 = vld [vmem:[%s2961_s6] sm:$0x1f] }
 0x571   :  { %v2744_v13 = vadd.f32 %v534_v10, %v2691_v7  ;;  %v573_v10 = vrot.slane %v2764_v6, %v2759_v4  ;;  %v607_v48 = vrot.slane %v598_v43, %v2767_v8  ;;  %v2811_v43 = vld [vmem:[#allocation2 + $0x28] sm:$0xff] }
 0x572   :  { %v2741_v12 = vadd.f32 %v529_v11, %v2682_v5 }
 0x573   :  { %v542_v18 = vsel %vm152_vm0, %v2744_v13, 0.0  ;;  %v549_v5 = vmul.f32 %v2744_v13, %v2744_v13 }
 0x574   :  { %v539_v14 = vsel %vm152_vm0, %v2741_v12, 0.0  ;;  %v548_v15 = vmul.f32 %v2741_v12, %v2741_v12 }
 0x575   :  { %540 = vadd.xlane.f32.xlu1 %v539_v14  ;;  %v553_v7 = vsel %vm152_vm0, %v549_v5, 0.0  ;;  %v790_v5 = vld [vmem:[#allocation8 + $0x10] sm:$0xff] }
 0x576   :  { %v550_v16 = vsel %vm152_vm0, %v548_v15, 0.0  ;;  %v579_v15 = vrot.slane %v2764_v6, %v2767_v8 }
 0x577   :  { %551 = vadd.xlane.f32.xlu0 %v550_v16  ;;  %v788_v16 = vld [vmem:[#allocation8] sm:$0xff] }
 0x579   :  { %543 = vadd.xlane.f32.xlu1 %v542_v18  ;;  %v792_v18 = vld [vmem:[#allocation8 + $0x20] sm:$0xff] }
 0x57a   :  { %v2260_v27 = vpack.c.bf16 %v792_v18, %v788_v16  ;;  %v806_v18 = vsub.s32 4, %v2711_v20 }
 0x57d   :  { %554 = vadd.xlane.f32.xlu1 %v553_v7  ;;  %v794_v7 = vld [vmem:[#allocation8 + $0x30] sm:$0xff] }
 0x57e   :  { %v2268_v29 = vpack.c.bf16 %v794_v7, %v790_v5  ;;  %v807_v5 = vrot.slane %v2764_v6, %v806_v18 }
 0x602   :  { %v541_v54 = vpop.xlane.xlu1 %540 }
 0x603   :  { %v546_v55 = vmul.f32 0.03125, %v541_v54 }
 0x604   :  { %v552_v56 = vpop.xlane.xlu0 %551 }
 0x605   :  { %v558_v57 = vmul.f32 %v546_v55, %v546_v55  ;;  %v556_v58 = vmul.f32 0.03125, %v552_v56  ;;  %v562_v9 = vsub.f32 %v2741_v12, %v546_v55 }
 0x606   :  { %v544_v59 = vpop.xlane.xlu1 %543 }
 0x607   :  { %v560_v60 = vsub.f32 %v556_v58, %v558_v57  ;;  %v547_v61 = vmul.f32 0.03125, %v544_v59 }
 0x609   :  { %v564_v62 = vadd.f32 1e-05, %v560_v60  ;;  %v559_v0 = vmul.f32 %v547_v61, %v547_v61  ;;  %v563_v26 = vsub.f32 %v2744_v13, %v547_v61 }
 0x60a   :  { %v555_v63 = vpop.xlane.xlu1 %554 }
 0x60b   :  { %2405 = vrsqrt.f32 %v564_v62  ;;  %v557_v1 = vmul.f32 0.03125, %v555_v63 }
 0x60d   :  { %v561_v2 = vsub.f32 %v557_v1, %v559_v0 }
 0x60f   :  { %v565_v3 = vadd.f32 1e-05, %v561_v2 }
 0x611   :  { %2407 = vrsqrt.f32 %v565_v3 }
 0x615   :  { %v2406_v11 = vpop.eup %2405 }
 0x616   :  { %v568_v14 = vmul.f32 %v2406_v11, %v562_v9 }
 0x618   :  { %v574_v21 = vmul.f32 %v573_v10, %v568_v14 }
 0x61a   :  { %v2775_v12 = vadd.f32 %v579_v15, %v574_v21 }
 0x61b   :  { %v2408_v30 = vpop.eup %2407 }
 0x61c   :  { %2054 = vmatmul.mubr.msk.f32.vlgmr.msra.gmra.mrb[2].mxu0 %vm152_vm0, %v2775_v12  ;;  %2056 = vmatmul.mubr.msk.f32.vlgmr.msra.gmra.mrb[6].mxu1 %vm152_vm0, %v2775_v12  ;;  %v569_v34 = vmul.f32 %v2408_v30, %v563_v26 }
 0x61d   :  { %696 = vmatprep.mubr.f32.mxu0 %v2559_v46  ;;  %773 = vmatprep.mubr.f32.mxu1 %v2559_v46 }
 0x61e   :  { %v575_v35 = vmul.f32 %v573_v10, %v569_v34  ;;  %2261 = vmatpush1.bf16.xpose.msra.mxu0 %v2260_v27  ;;  %2269 = vmatpush1.bf16.xpose.msra.mxu1 %v2268_v29 }
 0x61f   :  { %2263 = vmatprep.subr.bf16.mxu0 %v2262_v32  ;;  %2271 = vmatprep.subr.bf16.mxu1 %v2270_v33 }
 0x620   :  { %v2783_v13 = vadd.f32 %v579_v15, %v575_v35 }
 0x622   :  { %2055 = vmatmul.mubr.msk.f32.gmra.mrb[4].mxu0 %vm152_vm0, %v2783_v13  ;;  %2057 = vmatmul.mubr.msk.f32.gmra.mrb[8].mxu1 %vm152_vm0, %v2783_v13 }
 0x626   :  { %2265 = vmatpush1.bf16.xpose.msra.mxu0 %v2264_v39  ;;  %2273 = vmatpush1.bf16.xpose.msra.mxu1 %v2272_v41  ;;  %v2809_v41 = vld [vmem:[#allocation2 + $0x20] sm:$0xff] }
 0x6ef   :  { %v692_v50 = vpop.f32.mrb[2].mxu0  ;;  %v769_v51 = vpop.f32.mrb[6].mxu1 }
 0x6f0   :  { %v693_v52 = vadd.f32 %v692_v50, %v603_v45  ;;  %v770_v53 = vadd.f32 %v769_v51, %v611_v47  ;;  %v694_v54 = vpop.f32.mrb[3].mxu0  ;;  %v771_v55 = vpop.f32.mrb[7].mxu1 }
 0x6f1   :  { %v695_v56 = vadd.f32 %v694_v54, %v607_v48  ;;  %v772_v57 = vadd.f32 %v771_v55, %v615_v49 }
 0x6f2   :  { %v780_v60 = vmax.f32 %v693_v52, 0.0  ;;  %v782_v61 = vmax.f32 %v770_v53, 0.0 }
 0x6f3   :  { %v781_v58 = vmax.f32 %v695_v56, 0.0  ;;  %v783_v59 = vmax.f32 %v772_v57, 0.0 }
 0x6f5   :  { %v698_v62 = vpop.f32.mrb[4].mxu0  ;;  %v775_v63 = vpop.f32.mrb[8].mxu1  ;;  %872 = vmatprep.mubr.f32.mxu0 %v781_v58  ;;  %947 = vmatprep.mubr.f32.mxu1 %v783_v59 }
 0x6f6   :  { %v699_v0 = vadd.f32 %v698_v62, %v603_v45  ;;  %v776_v1 = vadd.f32 %v775_v63, %v611_v47  ;;  %v700_v2 = vpop.f32.mrb[5].mxu0  ;;  %v777_v3 = vpop.f32.mrb[9].mxu1  ;;  %873 = vmatmul.mubr.f32.vlgmr.msra.gmra.mrb[6].mxu0 %v780_v60  ;;  %948 = vmatmul.mubr.f32.vlgmr.msra.gmra.mrb[10].mxu1 %v782_v61  ;;  %v2274_v45 = vpack.c.bf16 %v2811_v43, %v2809_v41  ;;  %v2815_v47 = vld [vmem:[#allocation2 + $0x30] sm:$0xff] }
 0x6f7   :  { %v701_v9 = vadd.f32 %v700_v2, %v607_v48  ;;  %v778_v10 = vadd.f32 %v777_v3, %v615_v49  ;;  %v2817_v48 = vld [vmem:[#allocation2 + $0x38] sm:$0xff]  ;;  %v999_v3 = vrot.slane %v2764_v6, %v2793_v44 }
 0x6f8   :  { %v784_v15 = vmax.f32 %v699_v0, 0.0  ;;  %v786_v16 = vmax.f32 %v776_v1, 0.0  ;;  %2275 = vmatprep.subr.bf16.mxu0 %v2274_v45  ;;  %v993_v0 = vrot.slane %v2764_v6, %v2790_v42 }
 0x6f9   :  { %v785_v11 = vmax.f32 %v701_v9, 0.0  ;;  %v787_v14 = vmax.f32 %v778_v10, 0.0  ;;  %2277 = vmatpush3.bf16.msra.mxu0 %v2274_v45 }
 0x6fb   :  { %877 = vmatprep.mubr.f32.mxu0 %v785_v11  ;;  %952 = vmatprep.mubr.f32.mxu1 %v787_v14 }
 0x6fc   :  { %878 = vmatmul.mubr.f32.gmra.mrb[8].mxu0 %v784_v15  ;;  %953 = vmatmul.mubr.f32.gmra.mrb[12].mxu1 %v786_v16 }
 0x7c9   :  { %v874_v7 = vpop.f32.mrb[6].mxu0  ;;  %v949_v19 = vpop.f32.mrb[10].mxu1 }
 0x7ca   :  { %v875_v21 = vadd.f32 %v874_v7, %v807_v5  ;;  %v876_v23 = vpop.f32.mrb[7].mxu0  ;;  %v951_v24 = vpop.f32.mrb[11].mxu1  ;;  %v2060_v7 = vld [vmem:[%s2957_s2 + $0x1] ss:$0 sm:$0xff] }
 0x7cc   :  { %v950_v25 = vadd.f32 %v949_v19, %v875_v21 }
 0x7ce   :  { %v958_v26 = vadd.f32 %v950_v25, %v2775_v12 }
 0x7cf   :  { %v879_v27 = vpop.f32.mrb[8].mxu0  ;;  %v954_v29 = vpop.f32.mrb[12].mxu1 }
 0x7d0   :  { %v880_v30 = vadd.f32 %v879_v27, %v807_v5  ;;  %v881_v32 = vpop.f32.mrb[9].mxu0  ;;  %v956_v33 = vpop.f32.mrb[13].mxu1  ;;  %v960_v34 = vsel %vm152_vm0, %v958_v26, 0.0  ;;  %v968_v35 = vmul.f32 %v958_v26, %v958_v26 }
 0x7d1   :  { %961 = vadd.xlane.f32.xlu1 %v960_v34 }
 0x7d2   :  { %v955_v36 = vadd.f32 %v954_v29, %v880_v30  ;;  %v970_v37 = vsel %vm152_vm0, %v968_v35, 0.0 }
 0x7d3   :  { %971 = vadd.xlane.f32.xlu0 %v970_v37 }
 0x7d4   :  { %v959_v38 = vadd.f32 %v955_v36, %v2783_v13  ;;  %v2278_v13 = vpack.c.bf16 %v2817_v48, %v2815_v47 }
 0x7d6   :  { %v963_v39 = vsel %vm152_vm0, %v959_v38, 0.0  ;;  %v969_v40 = vmul.f32 %v959_v38, %v959_v38  ;;  %2279 = vmatprep.subr.bf16.mxu0 %v2278_v13 }
 0x7d7   :  { %964 = vadd.xlane.f32.xlu1 %v963_v39  ;;  %2281 = vmatpush3.bf16.msra.mxu0 %v2278_v13 }
 0x7d8   :  { %v973_v12 = vsel %vm152_vm0, %v969_v40, 0.0 }
 0x7db   :  { %974 = vadd.xlane.f32.xlu1 %v973_v12 }
 0x85e   :  { %v962_v49 = vpop.xlane.xlu1 %961 }
 0x85f   :  { %v966_v50 = vmul.f32 0.03125, %v962_v49 }
 0x860   :  { %v972_v51 = vpop.xlane.xlu0 %971 }
 0x861   :  { %v978_v52 = vmul.f32 %v966_v50, %v966_v50  ;;  %v976_v53 = vmul.f32 0.03125, %v972_v51  ;;  %v982_v63 = vsub.f32 %v958_v26, %v966_v50 }
 0x863   :  { %v980_v54 = vsub.f32 %v976_v53, %v978_v52  ;;  %v2392_v52 = vpack.i.bf16 %v2817_v48, %v2815_v47 }
 0x864   :  { %v965_v55 = vpop.xlane.xlu1 %964 }
 0x865   :  { %v984_v56 = vadd.f32 1e-05, %v980_v54  ;;  %v967_v57 = vmul.f32 0.03125, %v965_v55 }
 0x867   :  { %2409 = vrsqrt.f32 %v984_v56  ;;  %v979_v59 = vmul.f32 %v967_v57, %v967_v57  ;;  %v983_v11 = vsub.f32 %v959_v38, %v967_v57 }
 0x868   :  { %v975_v58 = vpop.xlane.xlu1 %974 }
 0x869   :  { %v977_v60 = vmul.f32 0.03125, %v975_v58 }
 0x86b   :  { %v981_v61 = vsub.f32 %v977_v60, %v979_v59 }
 0x86d   :  { %v985_v62 = vadd.f32 1e-05, %v981_v61 }
 0x86f   :  { %2411 = vrsqrt.f32 %v985_v62 }
 0x871   :  { %v2410_v1 = vpop.eup %2409 }
 0x872   :  { %v988_v2 = vmul.f32 %v2410_v1, %v982_v63 }
 0x874   :  { %v994_v9 = vmul.f32 %v993_v0, %v988_v2 }
 0x876   :  { %v2825_v10 = vadd.f32 %v999_v3, %v994_v9 }
 0x878   :  { %2170 = vmatprep.mubr.msk.f32.mxu0 %vm152_vm0, %v2825_v10 }
 0x879   :  { %v2412_v14 = vpop.eup %2411 }
 0x87a   :  { %v989_v15 = vmul.f32 %v2412_v14, %v983_v11 }
 0x87c   :  { %v995_v16 = vmul.f32 %v993_v0, %v989_v15 }
 0x87e   :  { %v2829_v5 = vadd.f32 %v999_v3, %v995_v16 }
 0x880   :  { %2171 = vmatmul.mubr.msk.f32.vlgmr.msra.gmra.mrb[10].mxu0 %vm152_vm0, %v2829_v5 }
 0x953   :  { %v2172_v6 = vpop.f32.mrb[10].mxu0 }
 0x954   :  { %v1095_v19 = vadd.f32 %v2172_v6, %v2060_v7  ;;  %v1089_v21 = vpop.f32.mrb[11].mxu0 }
 0x955   :  { %v1090_v23 = vadd.f32 %v2060_v7, %v1089_v21 }
 0x957   :  { %2177 = vmatprep.mubr.msk.f32.mxu1 %vm152_vm0, %v1090_v23  ;;  %v2377_v24 = vpack.i.bf16 %v1095_v19, %v1090_v23 }
 0x959   :  { %2378 = vrot.lane.b32.xlu0 %v2377_v24, %s2557_s26 }
 0x9cb   :  { %v2379_v25 = vpop.permute.xlu0 %2378 }
 0x9cc   :  { %v2381_v26 = vunpack.i.h.bf16 %v2379_v25  ;;  %v2380_v27 = vunpack.i.l.bf16 %v2379_v25 }
 0x9ce   :  { %v2282_v29 = vpack.c.bf16 %v2381_v26, %v2380_v27  ;;  %v1446_v26 = vld [vmem:[#allocation5 + $0x88] sm:$0xff] }
 0x9cf   :  { %v1450_v27 = vld [vmem:[#allocation5 + $0xa8] sm:$0xff] }
 0x9d0   :  { %2284 = vmatprep.subr.msk.bf16.mxu1 %vm2702_vm1, %v2282_v29 }
 0x9d1   :  { %2287 = vmatpush3.bf16.xpose.msk.msra.mxu1 %vm2702_vm1, %v2282_v29  ;;  %v1448_v29 = vld [vmem:[#allocation5 + $0x98] sm:$0xff] }
 0x9d8   :  { %2178 = vmatmul.mubr.msk.f32.vlgmr.msra.gmra.mrb[14].mxu1 %vm152_vm0, %v1095_v19 }
 0x9d9   :  { %1554 = vmatprep.mubr.f32.mxu1 %v2559_v46 }
 0xaab   :  { %v2179_v30 = vpop.f32.mrb[14].mxu1 }
 0xaac   :  { %v1178_v32 = vpop.f32.mrb[15].mxu1  ;;  %v1188_v33 = vmul.f32 0.17677669, %v2179_v30  ;;  %v2300_v30 = vpack.c.bf16 %v1450_v27, %v1446_v26  ;;  %v1662_v26 = vld [vmem:[#allocation8 + $0xc8] sm:$0xff] }
 0xaad   :  { %v1187_v34 = vmul.f32 0.17677669, %v1178_v32  ;;  %v1452_v32 = vld [vmem:[#allocation5 + $0xb8] sm:$0xff] }
 0xaae   :  { %v1190_v37 = vadd.f32 %v1188_v33, %v2718_v28  ;;  %v2387_v28 = vpack.i.bf16 %v2811_v43, %v2809_v41  ;;  %v1445_v33 = vld [vmem:[#allocation5 + $0x80] sm:$0xff]  ;;  %2301 = vmatprep.subr.bf16.mxu1 %v2300_v30 }
 0xaaf   :  { %v1189_v35 = vadd.f32 %v1187_v34, %v2720_v31  ;;  %v1449_v34 = vld [vmem:[#allocation5 + $0xa0] sm:$0xff] }
 0xab0   :  { %v1194_v38 = vsel %vm327_vm4, %v1190_v37, -inf  ;;  %2388 = vrot.lane.b32.xlu0 %v2387_v28, %s2549_s20  ;;  %v1455_v28 = vld [vmem:[#allocation5 + $0xd0] sm:$0xff]  ;;  %v1664_v30 = vld [vmem:[#allocation8 + $0xd8] sm:$0xff] }
 0xab1   :  { %v1191_v36 = vsel %vm327_vm4, %v1189_v35, -inf }
 0xab2   :  { %1192 = vmax.xlane.f32.xlu1 %v1191_v36  ;;  %v2302_v36 = vpack.c.bf16 %v1449_v34, %v1445_v33 }
 0xab4   :  { %2393 = vrot.lane.b32.xlu0 %v2392_v52, %s2549_s20  ;;  %2303 = vmatpush1.bf16.msra.mxu1 %v2302_v36  ;;  %v1459_v52 = vld [vmem:[#allocation5 + $0xf0] sm:$0xff] }
 0xab6   :  { %1195 = vmax.xlane.f32.xlu1 %v1194_v38  ;;  %v1451_v38 = vld [vmem:[#allocation5 + $0xb0] sm:$0xff] }
 0xab8   :  { %1316 = vrot.lane.b32.xlu0 %v2060_v7, %s2549_s20 }
 0xb22   :  { %v2389_v55 = vpop.permute.xlu0 %2388 }
 0xb23   :  { %v2391_v57 = vunpack.i.h.bf16 %v2389_v55  ;;  %v2390_v58 = vunpack.i.l.bf16 %v2389_v55  ;;  %v1658_v55 = vld [vmem:[#allocation8 + $0xa8] sm:$0xff] }
 0xb25   :  { %v2292_v43 = vpack.c.bf16 %v2391_v57, %v2390_v58  ;;  %v1660_v58 = vld [vmem:[#allocation8 + $0xb8] sm:$0xff] }
 0xb26   :  { %v2394_v61 = vpop.permute.xlu0 %2393 }
 0xb27   :  { %v2396_v62 = vunpack.i.h.bf16 %v2394_v61  ;;  %v2395_v47 = vunpack.i.l.bf16 %v2394_v61 }
 0xb29   :  { %v2296_v2 = vpack.c.bf16 %v2396_v62, %v2395_v47 }
 0xb2a   :  { %v1317_v11 = vpop.permute.xlu0 %1316 }
 0xb3f   :  { %v1193_v17 = vpop.xlane.xlu1 %1192 }
 0xb40   :  { %v1197_v39 = vsub.f32 %v1189_v35, %v1193_v17  ;;  %v2308_v35 = vpack.c.bf16 %v1452_v32, %v1448_v29  ;;  %v1666_v29 = vld [vmem:[#allocation8 + $0xe8] sm:$0xff]  ;;  %v1668_v32 = vld [vmem:[#allocation8 + $0xf8] sm:$0xff] }
 0xb42   :  { %v1199_v45 = vmul.f32 1.442695, %v1197_v39  ;;  %v1454_v39 = vld [vmem:[#allocation5 + $0xc8] sm:$0xff] }
 0xb43   :  { %v1196_v40 = vpop.xlane.xlu1 %1195 }
 0xb44   :  { %v1198_v12 = vsub.f32 %v1190_v37, %v1196_v40  ;;  %v1447_v37 = vld [vmem:[#allocation5 + $0x90] sm:$0xff]  ;;  %v1458_v40 = vld [vmem:[#allocation5 + $0xe8] sm:$0xff] }
 0xb45   :  { %v2310_v17 = vpack.c.bf16 %v1451_v38, %v1447_v37  ;;  %v2320_v37 = vpack.c.bf16 %v1666_v29, %v1662_v26  ;;  %v2328_v38 = vpack.c.bf16 %v1668_v32, %v1664_v30 }
 0xb46   :  { %v1201_v13 = vmul.f32 1.442695, %v1198_v12  ;;  %v1456_v12 = vld [vmem:[#allocation5 + $0xd8] sm:$0xff] }
 0xb48   :  { %2413 = vpow2.f32 %v1201_v13  ;;  %v1460_v13 = vld [vmem:[#allocation5 + $0xf8] sm:$0xff] }
 0xb49   :  { %2415 = vpow2.f32 %v1199_v45  ;;  %v2304_v45 = vpack.c.bf16 %v1458_v40, %v1454_v39  ;;  %v1661_v40 = vld [vmem:[#allocation8 + $0xc0] sm:$0xff] }
 0xb4b   :  { %2305 = vmatprep.subr.bf16.mxu1 %v2304_v45  ;;  %v1663_v45 = vld [vmem:[#allocation8 + $0xd0] sm:$0xff] }
 0xb52   :  { %v2414_v49 = vpop.eup %2413 }
 0xb53   :  { %v1206_v50 = vsel %vm327_vm4, %v2414_v49, 0.0  ;;  %v2416_v31 = vpop.eup %2415 }
 0xb54   :  { %1207 = vadd.xlane.f32.xlu1 %v1206_v50  ;;  %v1203_v51 = vsel %vm327_vm4, %v2416_v31, 0.0  ;;  %v1457_v50 = vld [vmem:[#allocation5 + $0xe0] sm:$0xff] }
 0xb58   :  { %1204 = vadd.xlane.f32.xlu1 %v1203_v51 }
 0xb69   :  { %2383 = vrot.lane.b32.xlu1 %v2377_v24, %s2554_s1 }
 0xbe1   :  { %v1208_v53 = vpop.xlane.xlu1 %1207 }
 0xbe2   :  { %2417 = vrcp.f32 %v1208_v53  ;;  %v2314_v53 = vpack.c.bf16 %v1459_v52, %v1455_v28 }
 0xbe5   :  { %v1205_v54 = vpop.xlane.xlu1 %1204 }
 0xbe6   :  { %2419 = vrcp.f32 %v1205_v54  ;;  %v1654_v54 = vld [vmem:[#allocation8 + $0x88] sm:$0xff] }
 0xbe7   :  { %v2316_v57 = vpack.c.bf16 %v1658_v55, %v1654_v54 }
 0xbe9   :  { %v2384_v56 = vpop.permute.xlu1 %2383 }
 0xbea   :  { %v2386_v59 = vunpack.i.h.bf16 %v2384_v56  ;;  %v2385_v60 = vunpack.i.l.bf16 %v2384_v56  ;;  %v1656_v56 = vld [vmem:[#allocation8 + $0x98] sm:$0xff] }
 0xbec   :  { %v2288_v41 = vpack.c.bf16 %v2386_v59, %v2385_v60  ;;  %v2418_v48 = vpop.eup %2417  ;;  %v2324_v59 = vpack.c.bf16 %v1660_v58, %v1656_v56 }
 0xbed   :  { %v1212_v1 = vmul.f32 %v2418_v48, %v2414_v49  ;;  %v1453_v49 = vld [vmem:[#allocation5 + $0xc0] sm:$0xff] }
 0xbee   :  { %2289 = vmatprep.subr.bf16.mxu0 %v2288_v41  ;;  %v2306_v51 = vpack.c.bf16 %v1457_v50, %v1453_v49  ;;  %v1667_v49 = vld [vmem:[#allocation8 + $0xf0] sm:$0xff] }
 0xbef   :  { %2291 = vmatpush3.bf16.msra.mxu0 %v2288_v41  ;;  %v2330_v50 = vpack.c.bf16 %v1667_v49, %v1663_v45 }
 0xbf0   :  { %v2420_v63 = vpop.eup %2419  ;;  %2293 = vmatprep.subr.bf16.mxu0 %v2292_v43  ;;  %2307 = vmatpush1.bf16.msra.mxu1 %v2306_v51 }
 0xbf1   :  { %v1211_v0 = vmul.f32 %v2420_v63, %v2416_v31  ;;  %v2312_v31 = vpack.c.bf16 %v1460_v13, %v1456_v12  ;;  %2317 = vmatprep.subr.bf16.mxu1 %v2316_v57  ;;  %v1665_v12 = vld [vmem:[#allocation8 + $0xe0] sm:$0xff] }
 0xbf2   :  { %v2322_v13 = vpack.c.bf16 %v1665_v12, %v1661_v40  ;;  %v1941_v40 = vld [vmem:[%s2962_s7 + $0x8] sm:$0xff]  ;;  %v1942_v12 = vld [vmem:[%s2962_s7 + $0x10] sm:$0xff] }
 0xbf3   :  { %2184 = vmatprep.mubr.msk.f32.mxu0 %vm327_vm4, %v1211_v0 }
 0xbf4   :  { %2185 = vmatmul.mubr.msk.f32.vlgmr.msra.gmra.mrb[12].mxu0 %vm327_vm4, %v1212_v1 }
 0xbf5   :  { %2295 = vmatpush3.bf16.msra.mxu0 %v2292_v43 }
 0xbf6   :  { %2297 = vmatprep.subr.bf16.mxu0 %v2296_v2 }
 0xbf9   :  { %2299 = vmatpush3.bf16.msra.mxu0 %v2296_v2 }
 0xbfa   :  { %2309 = vmatprep.subr.bf16.mxu0 %v2308_v35 }
 0xcc7   :  { %v2186_v3 = vpop.f32.mrb[12].mxu0 }
 0xcc8   :  { %v1291_v9 = vpop.f32.mrb[13].mxu0 }
 0xcc9   :  { %2195 = vmatprep.mubr.msk.f32.mxu0 %vm152_vm0, %v1291_v9 }
 0xcca   :  { %2196 = vmatmul.mubr.msk.f32.vlgmr.msra.gmra.mrb[14].mxu0 %vm152_vm0, %v2186_v3 }
 0xccb   :  { %1631 = vmatprep.mubr.f32.mxu0 %v2559_v46  ;;  %2311 = vmatpush1.bf16.msra.mxu0 %v2310_v17 }
 0xccc   :  { %2313 = vmatprep.subr.bf16.mxu0 %v2312_v31  ;;  %v1462_v31 = vld [vmem:[#allocation7 + $0x4] sm:$0xf] }
 0xccd   :  { %v1467_v51 = vrot.slane %v1462_v31, %v2759_v4  ;;  %v1475_v28 = vrot.slane %v1462_v31, %v2790_v42  ;;  %v1471_v52 = vrot.slane %v1462_v31, %v2767_v8 }
 0xccf   :  { %2315 = vmatpush1.bf16.msra.mxu0 %v2314_v53  ;;  %v1479_v53 = vrot.slane %v1462_v31, %v2793_v44 }
 0xcd0   :  { %2325 = vmatprep.subr.bf16.mxu0 %v2324_v59 }
 0xd9d   :  { %v2197_v14 = vpop.f32.mrb[14].mxu0 }
 0xd9e   :  { %v1391_v15 = vpop.f32.mrb[15].mxu0  ;;  %v1397_v16 = vadd.f32 %v2197_v14, %v1317_v11  ;;  %v2882_v14 = vld [vmem:[%s2961_s6 + $0x8] sm:$0x1f] }
 0xd9f   :  { %v1392_v7 = vadd.f32 %v1391_v15, %v1317_v11 }
 0xda0   :  { %v2867_v19 = vadd.f32 %v1397_v16, %v2829_v5  ;;  %v1435_v16 = vrot.slane %v2882_v14, %v2759_v4 }
 0xda1   :  { %v2864_v6 = vadd.f32 %v1392_v7, %v2825_v10 }
 0xda2   :  { %v1405_v25 = vsel %vm152_vm0, %v2867_v19, 0.0  ;;  %v1411_v10 = vmul.f32 %v2867_v19, %v2867_v19 }
 0xda3   :  { %v1402_v21 = vsel %vm152_vm0, %v2864_v6, 0.0  ;;  %v1410_v23 = vmul.f32 %v2864_v6, %v2864_v6 }
 0xda4   :  { %1403 = vadd.xlane.f32.xlu0 %v1402_v21  ;;  %v1415_v5 = vsel %vm152_vm0, %v1411_v10, 0.0  ;;  %v1655_v10 = vld [vmem:[#allocation8 + $0x90] sm:$0xff] }
 0xda5   :  { %v1412_v24 = vsel %vm152_vm0, %v1410_v23, 0.0  ;;  %v1441_v23 = vrot.slane %v2882_v14, %v2767_v8 }
 0xda6   :  { %1413 = vadd.xlane.f32.xlu1 %v1412_v24  ;;  %v1653_v24 = vld [vmem:[#allocation8 + $0x80] sm:$0xff] }
 0xda8   :  { %1406 = vadd.xlane.f32.xlu0 %v1405_v25  ;;  %v1657_v25 = vld [vmem:[#allocation8 + $0xa0] sm:$0xff] }
 0xda9   :  { %v2318_v34 = vpack.c.bf16 %v1657_v25, %v1653_v24 }
 0xdac   :  { %1416 = vadd.xlane.f32.xlu0 %v1415_v5  ;;  %v1659_v5 = vld [vmem:[#allocation8 + $0xb0] sm:$0xff] }
 0xdad   :  { %v2326_v35 = vpack.c.bf16 %v1659_v5, %v1655_v10 }
 0xe31   :  { %v1404_v60 = vpop.xlane.xlu0 %1403 }
 0xe32   :  { %v1408_v41 = vmul.f32 0.03125, %v1404_v60 }
 0xe33   :  { %v1414_v43 = vpop.xlane.xlu1 %1413 }
 0xe34   :  { %v1420_v61 = vmul.f32 %v1408_v41, %v1408_v41  ;;  %v1418_v62 = vmul.f32 0.03125, %v1414_v43  ;;  %v1424_v15 = vsub.f32 %v2864_v6, %v1408_v41 }
 0xe35   :  { %v1407_v47 = vpop.xlane.xlu0 %1406 }
 0xe36   :  { %v1422_v48 = vsub.f32 %v1418_v62, %v1420_v61  ;;  %v1409_v63 = vmul.f32 0.03125, %v1407_v47 }
 0xe38   :  { %v1426_v0 = vadd.f32 1e-05, %v1422_v48  ;;  %v1421_v2 = vmul.f32 %v1409_v63, %v1409_v63  ;;  %v1425_v33 = vsub.f32 %v2867_v19, %v1409_v63 }
 0xe39   :  { %v1417_v1 = vpop.xlane.xlu0 %1416 }
 0xe3a   :  { %2421 = vrsqrt.f32 %v1426_v0  ;;  %v1419_v3 = vmul.f32 0.03125, %v1417_v1 }
 0xe3c   :  { %v1423_v9 = vsub.f32 %v1419_v3, %v1421_v2 }
 0xe3e   :  { %v1427_v11 = vadd.f32 1e-05, %v1423_v9 }
 0xe40   :  { %2423 = vrsqrt.f32 %v1427_v11 }
 0xe44   :  { %v2422_v7 = vpop.eup %2421 }
 0xe45   :  { %v1430_v21 = vmul.f32 %v2422_v7, %v1424_v15  ;;  %v1672_v7 = vrot.slane %v2882_v14, %v806_v18 }
 0xe47   :  { %v1436_v27 = vmul.f32 %v1435_v16, %v1430_v21 }
 0xe49   :  { %v2890_v6 = vadd.f32 %v1441_v23, %v1436_v27 }
 0xe4a   :  { %v2424_v36 = vpop.eup %2423 }
 0xe4b   :  { %2071 = vmatmul.mubr.msk.f32.vlgmr.msra.gmra.mrb[16].mxu1 %vm152_vm0, %v2890_v6  ;;  %2073 = vmatmul.mubr.msk.f32.vlgmr.msra.gmra.mrb[16].mxu0 %vm152_vm0, %v2890_v6  ;;  %v1431_v17 = vmul.f32 %v2424_v36, %v1425_v33 }
 0xe4c   :  { %1560 = vmatprep.mubr.f32.mxu1 %v2559_v46  ;;  %1637 = vmatprep.mubr.f32.mxu0 %v2559_v46 }
 0xe4d   :  { %v1437_v39 = vmul.f32 %v1435_v16, %v1431_v17  ;;  %2319 = vmatpush1.bf16.xpose.msra.mxu1 %v2318_v34  ;;  %2327 = vmatpush1.bf16.xpose.msra.mxu0 %v2326_v35 }
 0xe4e   :  { %2321 = vmatprep.subr.bf16.mxu1 %v2320_v37  ;;  %2329 = vmatprep.subr.bf16.mxu0 %v2328_v38 }
 0xe4f   :  { %v2898_v19 = vadd.f32 %v1441_v23, %v1437_v39  ;;  %v2560_v39 = vmov 0.0|0.0  }
 0xe51   :  { %2072 = vmatmul.mubr.msk.f32.gmra.mrb[18].mxu1 %vm152_vm0, %v2898_v19  ;;  %2074 = vmatmul.mubr.msk.f32.gmra.mrb[18].mxu0 %vm152_vm0, %v2898_v19 }
 0xe55   :  { %2323 = vmatpush1.bf16.xpose.msra.mxu1 %v2322_v13  ;;  %2331 = vmatpush1.bf16.xpose.msra.mxu0 %v2330_v50  ;;  %v1943_v13 = vld [vmem:[%s2962_s7 + $0x18] sm:$0xff] }
 0xe56   :  { %2332 = vmatprep.subr.bf16.mxu1 %v2560_v39  ;;  %2335 = vmatprep.subr.bf16.mxu0 %v2560_v39  ;;  %v2339_v49 = vpack.c.bf16 %v1943_v13, %v1942_v12 }
 0xf1e   :  { %v1556_v54 = vpop.f32.mrb[16].mxu1  ;;  %v1633_v55 = vpop.f32.mrb[16].mxu0 }
 0xf1f   :  { %v1557_v56 = vadd.f32 %v1556_v54, %v1467_v51  ;;  %v1634_v57 = vadd.f32 %v1633_v55, %v1475_v28  ;;  %v1558_v58 = vpop.f32.mrb[17].mxu1  ;;  %v1635_v59 = vpop.f32.mrb[17].mxu0 }
 0xf20   :  { %v1559_v60 = vadd.f32 %v1558_v58, %v1471_v52  ;;  %v1636_v41 = vadd.f32 %v1635_v59, %v1479_v53 }
 0xf21   :  { %v1644_v62 = vmax.f32 %v1557_v56, 0.0  ;;  %v1646_v47 = vmax.f32 %v1634_v57, 0.0 }
 0xf22   :  { %v1645_v43 = vmax.f32 %v1559_v60, 0.0  ;;  %v1647_v61 = vmax.f32 %v1636_v41, 0.0 }
 0xf24   :  { %v1562_v48 = vpop.f32.mrb[18].mxu1  ;;  %v1639_v4 = vpop.f32.mrb[18].mxu0  ;;  %1737 = vmatprep.mubr.f32.mxu1 %v1645_v43  ;;  %1812 = vmatprep.mubr.f32.mxu0 %v1647_v61 }
 0xf25   :  { %v1563_v63 = vadd.f32 %v1562_v48, %v1467_v51  ;;  %v1640_v8 = vadd.f32 %v1639_v4, %v1475_v28  ;;  %v1564_v0 = vpop.f32.mrb[19].mxu1  ;;  %v1641_v1 = vpop.f32.mrb[19].mxu0  ;;  %1738 = vmatmul.mubr.f32.vlgmr.msra.gmra.mrb[20].mxu1 %v1644_v62  ;;  %1813 = vmatmul.mubr.f32.vlgmr.msra.gmra.mrb[20].mxu0 %v1646_v47  ;;  %v1858_v47 = vrot.slane %v2882_v14, %v2790_v42  ;;  %v135_v48 = vmul.u32 2, %v2711_v20 }
 0xf26   :  { %v1565_v2 = vadd.f32 %v1564_v0, %v1471_v52  ;;  %v1642_v3 = vadd.f32 %v1641_v1, %v1479_v53  ;;  %v1864_v1 = vrot.slane %v2882_v14, %v2793_v44  ;;  %v2076_v44 = vld [vmem:[%s2963_s8] ss:$0 sm:$0xff] }
 0xf27   :  { %v1648_v15 = vmax.f32 %v1563_v63, 0.0  ;;  %v1650_v16 = vmax.f32 %v1640_v8, 0.0 }
 0xf28   :  { %v1649_v9 = vmax.f32 %v1565_v2, 0.0  ;;  %v1651_v11 = vmax.f32 %v1642_v3, 0.0  ;;  %v136_v2 = vadd.s32 1, %v135_v48 }
 0xf2a   :  { %1742 = vmatprep.mubr.f32.mxu1 %v1649_v9  ;;  %1817 = vmatprep.mubr.f32.mxu0 %v1651_v11  ;;  %vm137_vm6 = vcmp.eq.s32.totalorder %v2714_v22, %v136_v2 }
 0xf2b   :  { %1743 = vmatmul.mubr.f32.gmra.mrb[22].mxu1 %v1648_v15  ;;  %1818 = vmatmul.mubr.f32.gmra.mrb[22].mxu0 %v1650_v16  ;;  %v2042_v16 = vsel %vm137_vm6, 1.0, %v2559_v46 }
 0xf2c   :  { %2202 = vmatprep.mubr.msk.f32.mxu1 %vm2561_vm5, %v2559_v46  ;;  %2213 = vmatprep.mubr.msk.f32.mxu0 %vm2561_vm5, %v2559_v46 }
 0xff8   :  { %v1739_v21 = vpop.f32.mrb[20].mxu1  ;;  %v1814_v23 = vpop.f32.mrb[20].mxu0 }
 0xff9   :  { %v1740_v24 = vadd.f32 %v1739_v21, %v1672_v7  ;;  %v1741_v25 = vpop.f32.mrb[21].mxu1  ;;  %v1816_v10 = vpop.f32.mrb[21].mxu0 }
 0xffb   :  { %v1815_v5 = vadd.f32 %v1814_v23, %v1740_v24 }
 0xffd   :  { %v1823_v26 = vadd.f32 %v1815_v5, %v2890_v6 }
 0xffe   :  { %v1744_v27 = vpop.f32.mrb[22].mxu1  ;;  %v1819_v29 = vpop.f32.mrb[22].mxu0 }
 0xfff   :  { %v1745_v30 = vadd.f32 %v1744_v27, %v1672_v7  ;;  %v1746_v32 = vpop.f32.mrb[23].mxu1  ;;  %v1821_v33 = vpop.f32.mrb[23].mxu0  ;;  %v1825_v34 = vsel %vm152_vm0, %v1823_v26, 0.0  ;;  %v1833_v35 = vmul.f32 %v1823_v26, %v1823_v26 }
0x1000   :  { %1826 = vadd.xlane.f32.xlu1 %v1825_v34 }
0x1001   :  { %v1820_v36 = vadd.f32 %v1819_v29, %v1745_v30  ;;  %v1835_v37 = vsel %vm152_vm0, %v1833_v35, 0.0 }
0x1003   :  { %v1824_v18 = vadd.f32 %v1820_v36, %v2898_v19  ;;  %v1940_v19 = vld [vmem:[%s2962_s7] sm:$0xff] }
0x1004   :  { %1836 = vadd.xlane.f32.xlu1 %v1835_v37  ;;  %v2336_v45 = vpack.c.bf16 %v1941_v40, %v1940_v19 }
0x1005   :  { %v1828_v38 = vsel %vm152_vm0, %v1824_v18, 0.0  ;;  %v1834_v17 = vmul.f32 %v1824_v18, %v1824_v18 }
0x1006   :  { %1829 = vadd.xlane.f32.xlu0 %v1828_v38  ;;  %2337 = vmatpush3.bf16.msra.mxu0 %v2336_v45 }
0x1007   :  { %v1838_v6 = vsel %vm152_vm0, %v1834_v17, 0.0  ;;  %2338 = vmatprep.subr.bf16.mxu0 %v2560_v39 }
0x100a   :  { %1839 = vadd.xlane.f32.xlu0 %v1838_v6  ;;  %2340 = vmatpush3.bf16.msra.mxu0 %v2339_v49 }
0x108d   :  { %v1827_v50 = vpop.xlane.xlu1 %1826 }
0x108e   :  { %v1831_v31 = vmul.f32 0.03125, %v1827_v50 }
0x1090   :  { %v1843_v28 = vmul.f32 %v1831_v31, %v1831_v31  ;;  %v1847_v61 = vsub.f32 %v1823_v26, %v1831_v31 }
0x1091   :  { %v1837_v51 = vpop.xlane.xlu1 %1836 }
0x1092   :  { %v1841_v52 = vmul.f32 0.03125, %v1837_v51 }
0x1093   :  { %v1830_v53 = vpop.xlane.xlu0 %1829 }
0x1094   :  { %v1845_v54 = vsub.f32 %v1841_v52, %v1843_v28  ;;  %v1832_v55 = vmul.f32 0.03125, %v1830_v53 }
0x1096   :  { %v1849_v56 = vadd.f32 1e-05, %v1845_v54  ;;  %v1844_v58 = vmul.f32 %v1832_v55, %v1832_v55  ;;  %v1848_v4 = vsub.f32 %v1824_v18, %v1832_v55 }
0x1097   :  { %v1840_v57 = vpop.xlane.xlu0 %1839 }
0x1098   :  { %2425 = vrsqrt.f32 %v1849_v56  ;;  %v1842_v59 = vmul.f32 0.03125, %v1840_v57 }
0x109a   :  { %v1846_v60 = vsub.f32 %v1842_v59, %v1844_v58 }
0x109c   :  { %v1850_v41 = vadd.f32 1e-05, %v1846_v60 }
0x109e   :  { %2427 = vrsqrt.f32 %v1850_v41 }
0x10a2   :  { %v2426_v43 = vpop.eup %2425 }
0x10a3   :  { %v1853_v62 = vmul.f32 %v2426_v43, %v1847_v61 }
0x10a5   :  { %v1859_v0 = vmul.f32 %v1858_v47, %v1853_v62 }
0x10a7   :  { %v1865_v9 = vadd.f32 %v1864_v1, %v1859_v0 }
0x10a8   :  { %v2428_v63 = vpop.eup %2427 }
0x10a9   :  { %v1854_v8 = vmul.f32 %v2428_v63, %v1848_v4 }
0x10ab   :  { %v1860_v3 = vmul.f32 %v1858_v47, %v1854_v8 }
0x10ad   :  { %v1866_v11 = vadd.f32 %v1864_v1, %v1860_v3 }
0x10af   :  { %v2333_v15 = vpack.c.bf16 %v1866_v11, %v1865_v9 }
0x10b1   :  { %2334 = vmatpush3.bf16.msra.mxu1 %v2333_v15 }
0x10b4   :  { %2203 = vmatmul.mubr.msk.f32.vlgmr.msra.gmra.mrb[24].mxu1 %vm327_vm4, %v2042_v16 }
0x1187   :  { %v1936_v20 = vpop.f32.mrb[24].mxu1 }
0x1188   :  { %v2204_v42 = vpop.f32.mrb[25].mxu1  ;;  %2214 = vmatmul.mubr.msk.f32.vlgmr.msra.gmra.mrb[24].mxu0 %vm152_vm0, %v1936_v20 }
0x125b   :  { %v2020_v14 = vpop.f32.mrb[24].mxu0 }
0x125c   :  { %v2021_v7 = vadd.f32 %v2076_v44, %v2020_v14  ;;  %v2215_v21 = vpop.f32.mrb[25].mxu0 }
0x125e   :  { %2024 = vst [vmem:[#allocation10] sm:$0xff] %v2021_v7 }
0x125f   :  { %2528 = shalt.err (!%p2525_p8)
}
0x1260   :  { %s2529_s16 = scalar_lea.hbm %s2964_s9, 128 }
0x1261   :  { %p2530_p9 = scmp.ne.s32.totalorder %s2964_s9, %s2529_s16  ;;  %p2533_p10 = scmp.lt.u32.totalorder %s2529_s16, %s2964_s9 }
0x1263   :  { %p2535_p11 = pnand %p2533_p10, %p2530_p9 }
0x1265   :  { %2538 = shalt.err (!%p2535_p11)
}
0x1266   :  { %2034 = dma.vmem_to_hbm [thread:$0]  %s2032_s15, 128, %s2964_s9, [#allocation4]  }
0x1267   :  { %2545 = dma.done.wait [#allocation4], 128  }
0x1268   :  { %2546 = vsyncadd [#allocation4], 4294967168 }
0x1269   :  { %2038 = vsyncpa [#allocation3], 1 }
0x126a   :  { %2039 = vsyncpa [#allocation6], 1 }
0x126b   :  { %2040 = vsyncpa [#allocation9], 1 }
0x126c   :  { %2041 = vsyncpa [#allocation4], 1 }

</bundles_post_ra>
